<compile_context>
chip_gen: v7x
topology: tpu7x:2x2x1
jax: 0.10.0
libtpu: 0.0.40
codegen_flags: <defaults>
</compile_context>

<pallas_src>
import functools
import math

import jax
import jax.numpy as jnp
from jax import lax
from jax.experimental import pallas as pl
from jax.experimental.pallas import tpu as pltpu


def _mha_kernel(*refs, n_heads, d_k, d_v, d_model, seq_len, batch_block, eps,
                has_mask, return_attn, compute_dtype, precision):
    if has_mask:
        (q_ref, k_ref, v_ref, mask_ref, wq_ref, wk_ref, wv_ref,
         pw_ref, pb_ref, gamma_ref, beta_ref, *out_refs) = refs
    else:
        (q_ref, k_ref, v_ref, wq_ref, wk_ref, wv_ref,
         pw_ref, pb_ref, gamma_ref, beta_ref, *out_refs) = refs
        mask_ref = None
    if return_attn:
        out_ref, heads_ref, attn_ref = out_refs
    else:
        (out_ref, heads_ref), attn_ref = out_refs, None

    L = seq_len
    bt = batch_block
    cdt = compute_dtype
    f32 = jnp.float32

    # Activations stay f32 (the residual needs them); cast to the MXU compute dtype only
    # for the dots.  All matmul accumulation is f32.
    q_res = q_ref[...]                                      # (bt*L, d_model)
    qm = q_res.astype(cdt)
    km = k_ref[...].astype(cdt)
    vm = v_ref[...].astype(cdt)

    # Fused per-head projections: 3 lane-dense MXU dots (not 3*n_heads tiny ones).
    # 1/sqrt(d_k) is already folded into wq_ref by the wrapper, so there is no per-tile
    # score scaling below.
    q_all = jnp.dot(qm, wq_ref[...], preferred_element_type=f32, precision=precision)
    k_all = jnp.dot(km, wk_ref[...], preferred_element_type=f32, precision=precision)
    v_all = jnp.dot(vm, wv_ref[...], preferred_element_type=f32, precision=precision)

    if has_mask:
        # int8 mask (1 = masked); cast to f32 before the compare so the i1 mask already has
        # the f32-native layout used by the select below.
        mask_b = mask_ref[...].astype(f32) != 0.0           # (bt,L,L) or (1,L,L), broadcasts

    pw = pw_ref[...]                                        # (n_heads*d_v, d_model)
    proj = None
    for h in range(n_heads):      # static + small; the batch is handled by the MXU batch dim
        qh = q_all[:, h * d_k:(h + 1) * d_k].reshape(bt, L, d_k)
        kh = k_all[:, h * d_k:(h + 1) * d_k].reshape(bt, L, d_k)
        vh = v_all[:, h * d_v:(h + 1) * d_v].reshape(bt, L, d_v)

        # Scores: contract the d_k axes directly (no transpose), all bt batch elements in
        # one MXU-batched dot.
        s = jnp.einsum("bqd,bkd->bqk", qh.astype(cdt), kh.astype(cdt),
                       preferred_element_type=f32, precision=precision)     # (bt, L, L)
        if has_mask:
            # NOTE: fully-masked rows produce NaN probabilities, matching torch softmax
            # over an all--inf row.
            s = jnp.where(mask_b, -jnp.inf, s)
        s = s - jnp.max(s, axis=-1, keepdims=True)
        p = jnp.exp(s)
        p = p / jnp.sum(p, axis=-1, keepdims=True)          # exact normalize (attn returned)

        if return_attn:
            attn_ref[h] = p.astype(attn_ref.dtype)          # per-head store, no concat

        ctx = jnp.einsum("bqk,bkd->bqd", p.astype(cdt), vh.astype(cdt),
                         preferred_element_type=f32, precision=precision)   # (bt, L, d_v)
        heads_ref[h] = ctx.astype(heads_ref.dtype)          # per-head store, no concat

        # concat_h(ctx_h) @ W.T == sum_h ctx_h @ W.T[h*d_v:(h+1)*d_v, :]; accumulating per
        # head keeps only one (bt*L, d_model) f32 accumulator live and never materializes
        # the head-concat slab.
        contrib = jnp.dot(ctx.reshape(bt * L, d_v).astype(cdt),
                          pw[h * d_v:(h + 1) * d_v, :],
                          preferred_element_type=f32, precision=precision)
        proj = contrib if proj is None else proj + contrib

    # Enclosing layer: projection bias, residual add, LayerNorm (torch-style unbiased std,
    # eps added to the std) -- all in f32.
    z = q_res + proj + pb_ref[...]
    mean = jnp.mean(z, axis=-1, keepdims=True)
    var_unbiased = jnp.sum((z - mean) ** 2, axis=-1, keepdims=True) / (d_model - 1)
    ln = (z - mean) / (jnp.sqrt(var_unbiased) + eps)
    out_ref[...] = (gamma_ref[...] * ln + beta_ref[...]).astype(out_ref.dtype)


def _fuse_heads(w):
    """(n_heads, d_model, d_x) -> (d_model, n_heads*d_x); column block h = w[h]."""
    n_heads, d_model, d_x = w.shape
    return jnp.transpose(w, (1, 0, 2)).reshape(d_model, n_heads * d_x)


def _vmem_budget():
    """(vmem_limit_bytes, prefer_split_grid) derived from the local chip's VMEM size."""
    try:
        vmem = int(pltpu.get_tpu_info().vmem_capacity_bytes)
    except Exception:                       # unknown runtime: assume the small (v7x) budget
        vmem = 64 * 1024 * 1024
    limit = int(min(100 * 1024 * 1024, vmem * 3 // 4))      # ~96 MiB on 128 MiB chips, 48 MiB on 64 MiB
    # Small-VMEM chips (v7x: 64 MiB/TC, 2 TCs/chip): keep the "parallel" grid >= 2 wide so
    # both TensorCores get work.  Big-VMEM 1-TC chips (v5e/v6e): collapsing the grid is
    # strictly better (fewer per-step overheads, bigger matmul M).
    prefer_split = vmem <= 80 * 1024 * 1024
    return limit, prefer_split


def _pick_batch_block(B, L, d_model, n_heads, d_k, d_v, return_attn, attn_itemsize,
                      vmem_limit, prefer_split):
    """Largest divisor of B whose per-step VMEM footprint fits the budget."""
    per_b = L * (
        2 * (3 * d_model * 4                               # q, k, v input blocks (x2 buffers)
             + d_model * 4                                 # layer-output block
             + n_heads * d_v * 4                           # per-head context block
             + (n_heads * L * attn_itemsize if return_attn else 0))  # attn block (dominant)
        + (2 * n_heads * d_k + n_heads * d_v) * 4          # q_all / k_all / v_all
        + 2 * n_heads * L * 4)                             # live scores / probs working set
    cap = max(1, int(vmem_limit * 0.6) // max(per_b, 1))
    if prefer_split and B >= 2:
        cap = min(cap, B // 2)
    bt = 1
    for d in range(1, B + 1):
        if B % d == 0 and d <= cap:
            bt = d
    return bt


def multi_head_attention(q, k, v, params, attn_mask=None, eps=1e-3, precise=False,
                         batch_block=None, return_attn=True, attn_dtype=jnp.float32):
    """q, k, v: (B, L, d_model) f32.  attn_mask: optional bool, (B, L, L) or shared (L, L),
    True = masked.  Returns (layer_out (B, L, d_model), heads (n_heads, B, L, d_v),
    attn (n_heads*B, L, L) in torch ordering h*B+b; attn is None if return_attn=False)."""
    B, L, d_model = q.shape
    wq, wk, wv = params["w_q"], params["w_k"], params["w_v"]
    n_heads, _, d_k = wq.shape
    d_v = wv.shape[-1]

    vmem_limit, prefer_split = _vmem_budget()
    if batch_block is None:
        batch_block = _pick_batch_block(B, L, d_model, n_heads, d_k, d_v, return_attn,
                                        jnp.dtype(attn_dtype).itemsize, vmem_limit,
                                        prefer_split)
    if B % batch_block != 0:
        raise ValueError("batch_block must divide B")
    bt = batch_block
    num_blocks = B // bt

    cdt = jnp.float32 if precise else jnp.bfloat16
    precision = lax.Precision.HIGHEST if precise else None

    # Head-fused, pre-scaled projection weights -> lane-dense (d_model, H*d) MXU operands.
    scale = 1.0 / math.sqrt(d_k)
    wq_f = (_fuse_heads(wq) * scale).astype(cdt)            # 1/sqrt(d_k) folded (one-time)
    wk_f = _fuse_heads(wk).astype(cdt)
    wv_f = _fuse_heads(wv).astype(cdt)
    pw_t = params["proj_w_t"].astype(cdt)                   # (H*d_v, d_model) == W.T
    pb = params["proj_b"].reshape(1, d_model).astype(jnp.float32)
    gamma = params["gamma"].reshape(1, d_model).astype(jnp.float32)
    beta = params["beta"].reshape(1, d_model).astype(jnp.float32)

    # Fold batch into the matmul M dimension (free layout reshape in XLA).
    q2 = q.reshape(B * L, d_model).astype(jnp.float32)
    k2 = k.reshape(B * L, d_model).astype(jnp.float32)
    v2 = v.reshape(B * L, d_model).astype(jnp.float32)

    has_mask = attn_mask is not None
    mask_inputs, mask_specs = (), ()
    if has_mask:
        if attn_mask.ndim == 2:                             # shared across the batch
            mask_i8 = attn_mask.astype(jnp.int8)[None]      # (1, L, L)
            mask_specs = (pl.BlockSpec((1, L, L), lambda i: (0, 0, 0)),)
        else:                                               # per-batch (B, L, L)
            mask_i8 = attn_mask.astype(jnp.int8)
            mask_specs = (pl.BlockSpec((bt, L, L), lambda i: (i, 0, 0)),)
        mask_inputs = (mask_i8,)

    kernel = functools.partial(
        _mha_kernel, n_heads=n_heads, d_k=d_k, d_v=d_v, d_model=d_model, seq_len=L,
        batch_block=bt, eps=eps, has_mask=has_mask, return_attn=return_attn,
        compute_dtype=cdt, precision=precision)

    in_specs = [
        pl.BlockSpec((bt * L, d_model), lambda i: (i, 0)),            # q (folded batch rows)
        pl.BlockSpec((bt * L, d_model), lambda i: (i, 0)),            # k
        pl.BlockSpec((bt * L, d_model), lambda i: (i, 0)),            # v
        *mask_specs,                                                  # int8 mask (optional)
        pl.BlockSpec((d_model, n_heads * d_k), lambda i: (0, 0)),     # fused, pre-scaled w_q
        pl.BlockSpec((d_model, n_heads * d_k), lambda i: (0, 0)),     # fused w_k
        pl.BlockSpec((d_model, n_heads * d_v), lambda i: (0, 0)),     # fused w_v
        pl.BlockSpec((n_heads * d_v, d_model), lambda i: (0, 0)),     # proj W.T
        pl.BlockSpec((1, d_model), lambda i: (0, 0)),                 # proj bias
        pl.BlockSpec((1, d_model), lambda i: (0, 0)),                 # gamma
        pl.BlockSpec((1, d_model), lambda i: (0, 0)),                 # beta
    ]
    out_specs = [
        pl.BlockSpec((bt * L, d_model), lambda i: (i, 0)),            # layer output
        pl.BlockSpec((n_heads, bt, L, d_v), lambda i: (0, i, 0, 0)),  # per-head contexts
    ]
    out_shape = [
        jax.ShapeDtypeStruct((B * L, d_model), jnp.float32),
        jax.ShapeDtypeStruct((n_heads, B, L, d_v), jnp.float32),
    ]
    if return_attn:
        out_specs.append(pl.BlockSpec((n_heads, bt, L, L), lambda i: (0, i, 0, 0)))
        out_shape.append(jax.ShapeDtypeStruct((n_heads, B, L, L), attn_dtype))

    outs = pl.pallas_call(
        kernel,
        grid_spec=pltpu.PrefetchScalarGridSpec(
            num_scalar_prefetch=0,
            grid=(num_blocks,),
            in_specs=in_specs,
            out_specs=out_specs),
        out_shape=out_shape,
        compiler_params=pltpu.CompilerParams(
            # "parallel" lets the 1-D batch grid shard across both v7x TensorCores; on
            # 1-TC chips the default batch_block collapses the grid instead.
            dimension_semantics=("parallel",),
            vmem_limit_bytes=vmem_limit),
    )(q2, k2, v2, *mask_inputs, wq_f, wk_f, wv_f, pw_t, pb, gamma, beta)

    if return_attn:
        out2, heads, attn_hb = outs
        attn = attn_hb.reshape(n_heads * B, L, L)           # torch ordering: row = h*B + b
    else:
        out2, heads = outs
        attn = None
    out = out2.reshape(B, L, d_model)
    return out, heads, attn


def _reference(q, k, v, params, attn_mask=None, eps=1e-3, compute_dtype=jnp.float32,
               precision=lax.Precision.HIGHEST):
    """Pure-JAX reference mirroring the PyTorch forward (eval mode).  compute_dtype /
    precision mirror the kernel's MXU settings so both modes share the same rounding
    points (accumulation stays f32).  The 1/sqrt(d_k) scale is folded into w_q exactly as
    in the kernel (algebraically identical to dividing the scores)."""
    cdt = compute_dtype
    wq, wk, wv = params["w_q"], params["w_k"], params["w_v"]
    n_heads, d_model, d_k = wq.shape
    d_v = wv.shape[-1]
    B, L, _ = q.shape
    wq_s = wq * (1.0 / math.sqrt(d_k))

    qs = jnp.einsum("bld,hdk->hblk", q.astype(cdt), wq_s.astype(cdt),
                    preferred_element_type=jnp.float32, precision=precision)
    ks = jnp.einsum("bld,hdk->hblk", k.astype(cdt), wk.astype(cdt),
                    preferred_element_type=jnp.float32, precision=precision)
    vs = jnp.einsum("bld,hdv->hblv", v.astype(cdt), wv.astype(cdt),
                    preferred_element_type=jnp.float32, precision=precision)
    s = jnp.einsum("hbqd,hbkd->hbqk", qs.astype(cdt), ks.astype(cdt),
                   preferred_element_type=jnp.float32, precision=precision)
    if attn_mask is not None:
        m = attn_mask if attn_mask.ndim == 3 else attn_mask[None]
        s = jnp.where(m[None], -jnp.inf, s)
    p = jax.nn.softmax(s, axis=-1)
    o = jnp.einsum("hbqk,hbkv->hbqv", p.astype(cdt), vs.astype(cdt),
                   preferred_element_type=jnp.float32, precision=precision)   # (H,B,L,d_v)
    concat = jnp.transpose(o, (1, 2, 0, 3)).reshape(B, L, n_heads * d_v)
    proj = jnp.einsum("blf,fd->bld", concat.astype(cdt),
                      params["proj_w_t"].astype(cdt),
                      preferred_element_type=jnp.float32,
                      precision=precision) + params["proj_b"]
    z = q + proj
    mean = z.mean(-1, keepdims=True)
    std = jnp.sqrt(((z - mean) ** 2).sum(-1, keepdims=True) / (d_model - 1))
    ln = (z - mean) / (std + eps)
    out = params["gamma"] * ln + params["beta"]
    return out, o, p.reshape(n_heads * B, L, L)


def init_params(key, d_k, d_v, d_model, n_heads):
    ks = jax.random.split(key, 5)
    xav_k = math.sqrt(2.0 / (d_model + d_k))
    xav_v = math.sqrt(2.0 / (d_model + d_v))
    w_q = xav_k * jax.random.normal(ks[0], (n_heads, d_model, d_k), jnp.float32)
    w_k = xav_k * jax.random.normal(ks[1], (n_heads, d_model, d_k), jnp.float32)
    w_v = xav_v * jax.random.normal(ks[2], (n_heads, d_model, d_v), jnp.float32)
    # Orthogonal init for the enclosing layer's projection weight W: (d_model, n_heads*d_v).
    a = jax.random.normal(ks[3], (d_model, n_heads * d_v), jnp.float32)
    qmat, _ = jnp.linalg.qr(a.T if d_model > n_heads * d_v else a)
    W = (qmat.T if d_model > n_heads * d_v else qmat)[:d_model, : n_heads * d_v]
    bound = 1.0 / math.sqrt(n_heads * d_v)
    proj_b = jax.random.uniform(ks[4], (d_model,), jnp.float32, -bound, bound)
    return {
        "w_q": w_q, "w_k": w_k, "w_v": w_v,
        "proj_w_t": W.T,                    # store W.T so the kernel computes x @ W.T
        "proj_b": proj_b,
        "gamma": jnp.ones((d_model,), jnp.float32),
        "beta": jnp.zeros((d_model,), jnp.float32),
    }


if __name__ == "__main__":
    d_model, d_k, d_v, n_heads = 32, 8, 8, 4
    B, L = 2, 8

    key = jax.random.PRNGKey(0)
    kq, kk, kv, kp = jax.random.split(key, 4)
    q = jax.random.normal(kq, (B, L, d_model), jnp.float32)
    k = jax.random.normal(kk, (B, L, d_model), jnp.float32)
    v = jax.random.normal(kv, (B, L, d_model), jnp.float32)
    params = init_params(kp, d_k, d_v, d_model, n_heads)

    # 1) precise mode (f32, Precision.HIGHEST dots), auto batch_block / grid.
    out, heads, attn = multi_head_attention(q, k, v, params, precise=True)
    jax.block_until_ready((out, heads, attn))
    r_out, r_heads, r_attn = _reference(q, k, v, params)
    assert jnp.allclose(out, r_out, atol=2e-3, rtol=2e-3), "output mismatch (precise)"
    assert jnp.allclose(heads, r_heads, atol=2e-3, rtol=2e-3), "head-output mismatch (precise)"
    assert jnp.allclose(attn, r_attn, atol=1e-3, rtol=1e-3), "attn mismatch (precise)"

    # 2) fast mode: bf16 MXU inputs (f32 accumulation), collapsed grid, bf16 attn output.
    out_f, heads_f, attn_f = multi_head_attention(q, k, v, params, precise=False,
                                                  batch_block=B, attn_dtype=jnp.bfloat16)
    jax.block_until_ready((out_f, heads_f, attn_f))
    b_out, b_heads, b_attn = _reference(q, k, v, params, compute_dtype=jnp.bfloat16,
                                        precision=None)
    assert jnp.allclose(out_f, b_out, atol=3e-2, rtol=3e-2), "output mismatch (fast)"
    assert jnp.allclose(heads_f, b_heads, atol=3e-2, rtol=3e-2), "head-output mismatch (fast)"
    assert jnp.allclose(attn_f.astype(jnp.float32), b_attn, atol=3e-2, rtol=3e-2), \
        "attn mismatch (fast)"

    # 3) precise mode with a per-batch causal mask (True = masked).
    causal = jnp.triu(jnp.ones((L, L), dtype=jnp.bool_), k=1)
    mask3 = jnp.broadcast_to(causal, (B, L, L))
    out_m, heads_m, attn_m = multi_head_attention(q, k, v, params, attn_mask=mask3,
                                                  precise=True)
    jax.block_until_ready((out_m, heads_m, attn_m))
    m_out, m_heads, m_attn = _reference(q, k, v, params, attn_mask=mask3)
    assert jnp.allclose(out_m, m_out, atol=2e-3, rtol=2e-3), "output mismatch (masked)"
    assert jnp.allclose(heads_m, m_heads, atol=2e-3, rtol=2e-3), "head-output mismatch (masked)"
    assert jnp.allclose(attn_m, m_attn, atol=1e-3, rtol=1e-3), "attn mismatch (masked)"

    # 3b) shared 2-D mask path must agree with the broadcast 3-D mask.
    out_s, heads_s, attn_s = multi_head_attention(q, k, v, params, attn_mask=causal,
                                                  precise=True)
    jax.block_until_ready((out_s, heads_s, attn_s))
    assert jnp.allclose(out_s, m_out, atol=2e-3, rtol=2e-3), "output mismatch (shared mask)"
    assert jnp.allclose(attn_s, m_attn, atol=1e-3, rtol=1e-3), "attn mismatch (shared mask)"

    # 4) return_attn=False path (skips the dominant attn-probability writeback entirely).
    out_n, heads_n, attn_n = multi_head_attention(q, k, v, params, precise=True,
                                                  return_attn=False)
    jax.block_until_ready((out_n, heads_n))
    assert attn_n is None
    assert jnp.allclose(out_n, r_out, atol=2e-3, rtol=2e-3), "output mismatch (no-attn)"
    assert jnp.allclose(heads_n, r_heads, atol=2e-3, rtol=2e-3), "head mismatch (no-attn)"

    print("KERNEL_OK")
</pallas_src>

<mosaic_0001>
module attributes {stable_mosaic.version = 11 : i64} {
  func.func @_mha_kernel(%arg0: i32, %arg1: memref<8x32xf32, #tpu.memory_space<vmem>>, %arg2: memref<8x32xf32, #tpu.memory_space<vmem>>, %arg3: memref<8x32xf32, #tpu.memory_space<vmem>>, %arg4: memref<32x32xf32, #tpu.memory_space<vmem>>, %arg5: memref<32x32xf32, #tpu.memory_space<vmem>>, %arg6: memref<32x32xf32, #tpu.memory_space<vmem>>, %arg7: memref<32x32xf32, #tpu.memory_space<vmem>>, %arg8: memref<1x32xf32, #tpu.memory_space<vmem>>, %arg9: memref<1x32xf32, #tpu.memory_space<vmem>>, %arg10: memref<1x32xf32, #tpu.memory_space<vmem>>, %arg11: memref<8x32xf32, #tpu.memory_space<vmem>>, %arg12: memref<4x1x8x8xf32, #tpu.memory_space<vmem>>, %arg13: memref<4x1x8x8xf32, #tpu.memory_space<vmem>>) attributes {dimension_semantics = [#tpu.dimension_semantics<parallel>], iteration_bounds = array<i64: 2>, scalar_prefetch = 0 : i64, scratch_operands = 0 : i64, tpu.core_type = #tpu.core_type<tc>, window_params = [{transform_indices = @transform_0, window_bounds = array<i64: 8, 32>}, {transform_indices = @transform_1, window_bounds = array<i64: 8, 32>}, {transform_indices = @transform_2, window_bounds = array<i64: 8, 32>}, {pipeline_mode = #tpu.pipeline_mode<synchronous>, transform_indices = @transform_3, window_bounds = array<i64: 32, 32>}, {pipeline_mode = #tpu.pipeline_mode<synchronous>, transform_indices = @transform_4, window_bounds = array<i64: 32, 32>}, {pipeline_mode = #tpu.pipeline_mode<synchronous>, transform_indices = @transform_5, window_bounds = array<i64: 32, 32>}, {pipeline_mode = #tpu.pipeline_mode<synchronous>, transform_indices = @transform_6, window_bounds = array<i64: 32, 32>}, {pipeline_mode = #tpu.pipeline_mode<synchronous>, transform_indices = @transform_7, window_bounds = array<i64: 1, 32>}, {pipeline_mode = #tpu.pipeline_mode<synchronous>, transform_indices = @transform_8, window_bounds = array<i64: 1, 32>}, {pipeline_mode = #tpu.pipeline_mode<synchronous>, transform_indices = @transform_9, window_bounds = array<i64: 1, 32>}, {transform_indices = @transform_10, window_bounds = array<i64: 8, 32>}, {transform_indices = @transform_11, window_bounds = array<i64: 4, 1, 8, 8>}, {transform_indices = @transform_12, window_bounds = array<i64: 4, 1, 8, 8>}]} {
    %c0 = arith.constant 0 : index
    %c0_0 = arith.constant 0 : index
    %0 = vector.load %arg1[%c0, %c0_0] : memref<8x32xf32, #tpu.memory_space<vmem>>, vector<8x32xf32>
    %c0_1 = arith.constant 0 : index
    %c0_2 = arith.constant 0 : index
    %1 = vector.load %arg2[%c0_1, %c0_2] : memref<8x32xf32, #tpu.memory_space<vmem>>, vector<8x32xf32>
    %c0_3 = arith.constant 0 : index
    %c0_4 = arith.constant 0 : index
    %2 = vector.load %arg3[%c0_3, %c0_4] : memref<8x32xf32, #tpu.memory_space<vmem>>, vector<8x32xf32>
    %c0_5 = arith.constant 0 : index
    %c0_6 = arith.constant 0 : index
    %3 = vector.load %arg4[%c0_5, %c0_6] : memref<32x32xf32, #tpu.memory_space<vmem>>, vector<32x32xf32>
    %cst = arith.constant dense<0.000000e+00> : vector<8x32xf32>
    %4 = tpu.matmul %0, %3, %cst {dimension_numbers = #tpu.dot_dimension_numbers<[1], [0], [0], [1], [0, 0, 1, 1], [], []>, precision = #tpu.contract_precision<fp32>} : vector<8x32xf32>, vector<32x32xf32>, vector<8x32xf32> -> vector<8x32xf32>
    %c0_7 = arith.constant 0 : index
    %c0_8 = arith.constant 0 : index
    %5 = vector.load %arg5[%c0_7, %c0_8] : memref<32x32xf32, #tpu.memory_space<vmem>>, vector<32x32xf32>
    %cst_9 = arith.constant dense<0.000000e+00> : vector<8x32xf32>
    %6 = tpu.matmul %1, %5, %cst_9 {dimension_numbers = #tpu.dot_dimension_numbers<[1], [0], [0], [1], [0, 0, 1, 1], [], []>, precision = #tpu.contract_precision<fp32>} : vector<8x32xf32>, vector<32x32xf32>, vector<8x32xf32> -> vector<8x32xf32>
    %c0_10 = arith.constant 0 : index
    %c0_11 = arith.constant 0 : index
    %7 = vector.load %arg6[%c0_10, %c0_11] : memref<32x32xf32, #tpu.memory_space<vmem>>, vector<32x32xf32>
    %cst_12 = arith.constant dense<0.000000e+00> : vector<8x32xf32>
    %8 = tpu.matmul %2, %7, %cst_12 {dimension_numbers = #tpu.dot_dimension_numbers<[1], [0], [0], [1], [0, 0, 1, 1], [], []>, precision = #tpu.contract_precision<fp32>} : vector<8x32xf32>, vector<32x32xf32>, vector<8x32xf32> -> vector<8x32xf32>
    %c0_13 = arith.constant 0 : index
    %c0_14 = arith.constant 0 : index
    %9 = vector.load %arg7[%c0_13, %c0_14] : memref<32x32xf32, #tpu.memory_space<vmem>>, vector<32x32xf32>
    %10 = vector.extract_strided_slice %4 {offsets = [0, 0], sizes = [8, 8], strides = [1, 1]} : vector<8x32xf32> to vector<8x8xf32>
    %11 = vector.shape_cast %10 : vector<8x8xf32> to vector<1x8x8xf32>
    %12 = vector.extract_strided_slice %6 {offsets = [0, 0], sizes = [8, 8], strides = [1, 1]} : vector<8x32xf32> to vector<8x8xf32>
    %13 = vector.shape_cast %12 : vector<8x8xf32> to vector<1x8x8xf32>
    %14 = vector.extract_strided_slice %8 {offsets = [0, 0], sizes = [8, 8], strides = [1, 1]} : vector<8x32xf32> to vector<8x8xf32>
    %15 = vector.shape_cast %14 : vector<8x8xf32> to vector<1x8x8xf32>
    "tpu.trace_start"() <{level = 10 : i32, message = "bqd,bkd->bqk"}> : () -> ()
    %cst_15 = arith.constant dense<0.000000e+00> : vector<1x8x8xf32>
    %16 = tpu.matmul %11, %13, %cst_15 {dimension_numbers = #tpu.dot_dimension_numbers<[2], [2], [1], [1], [0, 0, 0, 1, 1, 1], [0], [0]>, precision = #tpu.contract_precision<fp32>} : vector<1x8x8xf32>, vector<1x8x8xf32>, vector<1x8x8xf32> -> vector<1x8x8xf32>
    "tpu.trace_stop"() : () -> ()
    %cst_16 = arith.constant dense<0xFF800000> : vector<1x8xf32>
    %17 = vector.multi_reduction <maximumf>, %16, %cst_16 [2] : vector<1x8x8xf32> to vector<1x8xf32>
    %18 = vector.shape_cast %17 : vector<1x8xf32> to vector<1x8x1xf32>
    %19 = vector.broadcast %18 : vector<1x8x1xf32> to vector<1x8x8xf32>
    %20 = arith.subf %16, %19 : vector<1x8x8xf32>
    %21 = math.exp %20 : vector<1x8x8xf32>
    %cst_17 = arith.constant dense<0.000000e+00> : vector<1x8xf32>
    %22 = vector.multi_reduction <add>, %21, %cst_17 [2] : vector<1x8x8xf32> to vector<1x8xf32>
    %23 = vector.shape_cast %22 : vector<1x8xf32> to vector<1x8x1xf32>
    %24 = vector.broadcast %23 : vector<1x8x1xf32> to vector<1x8x8xf32>
    %25 = arith.divf %21, %24 : vector<1x8x8xf32>
    %c0_18 = arith.constant 0 : index
    %c0_19 = arith.constant 0 : index
    %c0_20 = arith.constant 0 : index
    %c0_21 = arith.constant 0 : index
    %26 = vector.load %arg13[%c0_18, %c0_19, %c0_20, %c0_21] : memref<4x1x8x8xf32, #tpu.memory_space<vmem>>, vector<1x1x8x8xf32>
    %27 = vector.shape_cast %26 : vector<1x1x8x8xf32> to vector<1x8x8xf32>
    %28 = vector.shape_cast %25 : vector<1x8x8xf32> to vector<1x1x8x8xf32>
    tpu.vector_store %arg13[%c0_18, %c0_19, %c0_20, %c0_21], %28 {strides = array<i32>} : memref<4x1x8x8xf32, #tpu.memory_space<vmem>>, vector<1x1x8x8xf32>,
    "tpu.trace_start"() <{level = 10 : i32, message = "bqk,bkd->bqd"}> : () -> ()
    %cst_22 = arith.constant dense<0.000000e+00> : vector<1x8x8xf32>
    %29 = tpu.matmul %25, %15, %cst_22 {dimension_numbers = #tpu.dot_dimension_numbers<[2], [1], [1], [2], [0, 0, 0, 1, 1, 2], [0], [0]>, precision = #tpu.contract_precision<fp32>} : vector<1x8x8xf32>, vector<1x8x8xf32>, vector<1x8x8xf32> -> vector<1x8x8xf32>
    "tpu.trace_stop"() : () -> ()
    %c0_23 = arith.constant 0 : index
    %c0_24 = arith.constant 0 : index
    %c0_25 = arith.constant 0 : index
    %c0_26 = arith.constant 0 : index
    %30 = vector.load %arg12[%c0_23, %c0_24, %c0_25, %c0_26] : memref<4x1x8x8xf32, #tpu.memory_space<vmem>>, vector<1x1x8x8xf32>
    %31 = vector.shape_cast %30 : vector<1x1x8x8xf32> to vector<1x8x8xf32>
    %32 = vector.shape_cast %29 : vector<1x8x8xf32> to vector<1x1x8x8xf32>
    tpu.vector_store %arg12[%c0_23, %c0_24, %c0_25, %c0_26], %32 {strides = array<i32>} : memref<4x1x8x8xf32, #tpu.memory_space<vmem>>, vector<1x1x8x8xf32>,
    %33 = vector.shape_cast %29 : vector<1x8x8xf32> to vector<8x8xf32>
    %34 = vector.extract_strided_slice %9 {offsets = [0, 0], sizes = [8, 32], strides = [1, 1]} : vector<32x32xf32> to vector<8x32xf32>
    %cst_27 = arith.constant dense<0.000000e+00> : vector<8x32xf32>
    %35 = tpu.matmul %33, %34, %cst_27 {dimension_numbers = #tpu.dot_dimension_numbers<[1], [0], [0], [1], [0, 0, 1, 1], [], []>, precision = #tpu.contract_precision<fp32>} : vector<8x8xf32>, vector<8x32xf32>, vector<8x32xf32> -> vector<8x32xf32>
    %36 = vector.extract_strided_slice %4 {offsets = [0, 8], sizes = [8, 8], strides = [1, 1]} : vector<8x32xf32> to vector<8x8xf32>
    %37 = vector.shape_cast %36 : vector<8x8xf32> to vector<1x8x8xf32>
    %38 = vector.extract_strided_slice %6 {offsets = [0, 8], sizes = [8, 8], strides = [1, 1]} : vector<8x32xf32> to vector<8x8xf32>
    %39 = vector.shape_cast %38 : vector<8x8xf32> to vector<1x8x8xf32>
    %40 = vector.extract_strided_slice %8 {offsets = [0, 8], sizes = [8, 8], strides = [1, 1]} : vector<8x32xf32> to vector<8x8xf32>
    %41 = vector.shape_cast %40 : vector<8x8xf32> to vector<1x8x8xf32>
    "tpu.trace_start"() <{level = 10 : i32, message = "bqd,bkd->bqk"}> : () -> ()
    %cst_28 = arith.constant dense<0.000000e+00> : vector<1x8x8xf32>
    %42 = tpu.matmul %37, %39, %cst_28 {dimension_numbers = #tpu.dot_dimension_numbers<[2], [2], [1], [1], [0, 0, 0, 1, 1, 1], [0], [0]>, precision = #tpu.contract_precision<fp32>} : vector<1x8x8xf32>, vector<1x8x8xf32>, vector<1x8x8xf32> -> vector<1x8x8xf32>
    "tpu.trace_stop"() : () -> ()
    %cst_29 = arith.constant dense<0xFF800000> : vector<1x8xf32>
    %43 = vector.multi_reduction <maximumf>, %42, %cst_29 [2] : vector<1x8x8xf32> to vector<1x8xf32>
    %44 = vector.shape_cast %43 : vector<1x8xf32> to vector<1x8x1xf32>
    %45 = vector.broadcast %44 : vector<1x8x1xf32> to vector<1x8x8xf32>
    %46 = arith.subf %42, %45 : vector<1x8x8xf32>
    %47 = math.exp %46 : vector<1x8x8xf32>
    %cst_30 = arith.constant dense<0.000000e+00> : vector<1x8xf32>
    %48 = vector.multi_reduction <add>, %47, %cst_30 [2] : vector<1x8x8xf32> to vector<1x8xf32>
    %49 = vector.shape_cast %48 : vector<1x8xf32> to vector<1x8x1xf32>
    %50 = vector.broadcast %49 : vector<1x8x1xf32> to vector<1x8x8xf32>
    %51 = arith.divf %47, %50 : vector<1x8x8xf32>
    %c1 = arith.constant 1 : index
    %c0_31 = arith.constant 0 : index
    %c0_32 = arith.constant 0 : index
    %c0_33 = arith.constant 0 : index
    %52 = vector.load %arg13[%c1, %c0_31, %c0_32, %c0_33] : memref<4x1x8x8xf32, #tpu.memory_space<vmem>>, vector<1x1x8x8xf32>
    %53 = vector.shape_cast %52 : vector<1x1x8x8xf32> to vector<1x8x8xf32>
    %54 = vector.shape_cast %51 : vector<1x8x8xf32> to vector<1x1x8x8xf32>
    tpu.vector_store %arg13[%c1, %c0_31, %c0_32, %c0_33], %54 {strides = array<i32>} : memref<4x1x8x8xf32, #tpu.memory_space<vmem>>, vector<1x1x8x8xf32>,
    "tpu.trace_start"() <{level = 10 : i32, message = "bqk,bkd->bqd"}> : () -> ()
    %cst_34 = arith.constant dense<0.000000e+00> : vector<1x8x8xf32>
    %55 = tpu.matmul %51, %41, %cst_34 {dimension_numbers = #tpu.dot_dimension_numbers<[2], [1], [1], [2], [0, 0, 0, 1, 1, 2], [0], [0]>, precision = #tpu.contract_precision<fp32>} : vector<1x8x8xf32>, vector<1x8x8xf32>, vector<1x8x8xf32> -> vector<1x8x8xf32>
    "tpu.trace_stop"() : () -> ()
    %c1_35 = arith.constant 1 : index
    %c0_36 = arith.constant 0 : index
    %c0_37 = arith.constant 0 : index
    %c0_38 = arith.constant 0 : index
    %56 = vector.load %arg12[%c1_35, %c0_36, %c0_37, %c0_38] : memref<4x1x8x8xf32, #tpu.memory_space<vmem>>, vector<1x1x8x8xf32>
    %57 = vector.shape_cast %56 : vector<1x1x8x8xf32> to vector<1x8x8xf32>
    %58 = vector.shape_cast %55 : vector<1x8x8xf32> to vector<1x1x8x8xf32>
    tpu.vector_store %arg12[%c1_35, %c0_36, %c0_37, %c0_38], %58 {strides = array<i32>} : memref<4x1x8x8xf32, #tpu.memory_space<vmem>>, vector<1x1x8x8xf32>,
    %59 = vector.shape_cast %55 : vector<1x8x8xf32> to vector<8x8xf32>
    %60 = vector.extract_strided_slice %9 {offsets = [8, 0], sizes = [8, 32], strides = [1, 1]} : vector<32x32xf32> to vector<8x32xf32>
    %cst_39 = arith.constant dense<0.000000e+00> : vector<8x32xf32>
    %61 = tpu.matmul %59, %60, %cst_39 {dimension_numbers = #tpu.dot_dimension_numbers<[1], [0], [0], [1], [0, 0, 1, 1], [], []>, precision = #tpu.contract_precision<fp32>} : vector<8x8xf32>, vector<8x32xf32>, vector<8x32xf32> -> vector<8x32xf32>
    %62 = arith.addf %35, %61 : vector<8x32xf32>
    %63 = vector.extract_strided_slice %4 {offsets = [0, 16], sizes = [8, 8], strides = [1, 1]} : vector<8x32xf32> to vector<8x8xf32>
    %64 = vector.shape_cast %63 : vector<8x8xf32> to vector<1x8x8xf32>
    %65 = vector.extract_strided_slice %6 {offsets = [0, 16], sizes = [8, 8], strides = [1, 1]} : vector<8x32xf32> to vector<8x8xf32>
    %66 = vector.shape_cast %65 : vector<8x8xf32> to vector<1x8x8xf32>
    %67 = vector.extract_strided_slice %8 {offsets = [0, 16], sizes = [8, 8], strides = [1, 1]} : vector<8x32xf32> to vector<8x8xf32>
    %68 = vector.shape_cast %67 : vector<8x8xf32> to vector<1x8x8xf32>
    "tpu.trace_start"() <{level = 10 : i32, message = "bqd,bkd->bqk"}> : () -> ()
    %cst_40 = arith.constant dense<0.000000e+00> : vector<1x8x8xf32>
    %69 = tpu.matmul %64, %66, %cst_40 {dimension_numbers = #tpu.dot_dimension_numbers<[2], [2], [1], [1], [0, 0, 0, 1, 1, 1], [0], [0]>, precision = #tpu.contract_precision<fp32>} : vector<1x8x8xf32>, vector<1x8x8xf32>, vector<1x8x8xf32> -> vector<1x8x8xf32>
    "tpu.trace_stop"() : () -> ()
    %cst_41 = arith.constant dense<0xFF800000> : vector<1x8xf32>
    %70 = vector.multi_reduction <maximumf>, %69, %cst_41 [2] : vector<1x8x8xf32> to vector<1x8xf32>
    %71 = vector.shape_cast %70 : vector<1x8xf32> to vector<1x8x1xf32>
    %72 = vector.broadcast %71 : vector<1x8x1xf32> to vector<1x8x8xf32>
    %73 = arith.subf %69, %72 : vector<1x8x8xf32>
    %74 = math.exp %73 : vector<1x8x8xf32>
    %cst_42 = arith.constant dense<0.000000e+00> : vector<1x8xf32>
    %75 = vector.multi_reduction <add>, %74, %cst_42 [2] : vector<1x8x8xf32> to vector<1x8xf32>
    %76 = vector.shape_cast %75 : vector<1x8xf32> to vector<1x8x1xf32>
    %77 = vector.broadcast %76 : vector<1x8x1xf32> to vector<1x8x8xf32>
    %78 = arith.divf %74, %77 : vector<1x8x8xf32>
    %c2 = arith.constant 2 : index
    %c0_43 = arith.constant 0 : index
    %c0_44 = arith.constant 0 : index
    %c0_45 = arith.constant 0 : index
    %79 = vector.load %arg13[%c2, %c0_43, %c0_44, %c0_45] : memref<4x1x8x8xf32, #tpu.memory_space<vmem>>, vector<1x1x8x8xf32>
    %80 = vector.shape_cast %79 : vector<1x1x8x8xf32> to vector<1x8x8xf32>
    %81 = vector.shape_cast %78 : vector<1x8x8xf32> to vector<1x1x8x8xf32>
    tpu.vector_store %arg13[%c2, %c0_43, %c0_44, %c0_45], %81 {strides = array<i32>} : memref<4x1x8x8xf32, #tpu.memory_space<vmem>>, vector<1x1x8x8xf32>,
    "tpu.trace_start"() <{level = 10 : i32, message = "bqk,bkd->bqd"}> : () -> ()
    %cst_46 = arith.constant dense<0.000000e+00> : vector<1x8x8xf32>
    %82 = tpu.matmul %78, %68, %cst_46 {dimension_numbers = #tpu.dot_dimension_numbers<[2], [1], [1], [2], [0, 0, 0, 1, 1, 2], [0], [0]>, precision = #tpu.contract_precision<fp32>} : vector<1x8x8xf32>, vector<1x8x8xf32>, vector<1x8x8xf32> -> vector<1x8x8xf32>
    "tpu.trace_stop"() : () -> ()
    %c2_47 = arith.constant 2 : index
    %c0_48 = arith.constant 0 : index
    %c0_49 = arith.constant 0 : index
    %c0_50 = arith.constant 0 : index
    %83 = vector.load %arg12[%c2_47, %c0_48, %c0_49, %c0_50] : memref<4x1x8x8xf32, #tpu.memory_space<vmem>>, vector<1x1x8x8xf32>
    %84 = vector.shape_cast %83 : vector<1x1x8x8xf32> to vector<1x8x8xf32>
    %85 = vector.shape_cast %82 : vector<1x8x8xf32> to vector<1x1x8x8xf32>
    tpu.vector_store %arg12[%c2_47, %c0_48, %c0_49, %c0_50], %85 {strides = array<i32>} : memref<4x1x8x8xf32, #tpu.memory_space<vmem>>, vector<1x1x8x8xf32>,
    %86 = vector.shape_cast %82 : vector<1x8x8xf32> to vector<8x8xf32>
    %87 = vector.extract_strided_slice %9 {offsets = [16, 0], sizes = [8, 32], strides = [1, 1]} : vector<32x32xf32> to vector<8x32xf32>
    %cst_51 = arith.constant dense<0.000000e+00> : vector<8x32xf32>
    %88 = tpu.matmul %86, %87, %cst_51 {dimension_numbers = #tpu.dot_dimension_numbers<[1], [0], [0], [1], [0, 0, 1, 1], [], []>, precision = #tpu.contract_precision<fp32>} : vector<8x8xf32>, vector<8x32xf32>, vector<8x32xf32> -> vector<8x32xf32>
    %89 = arith.addf %62, %88 : vector<8x32xf32>
    %90 = vector.extract_strided_slice %4 {offsets = [0, 24], sizes = [8, 8], strides = [1, 1]} : vector<8x32xf32> to vector<8x8xf32>
    %91 = vector.shape_cast %90 : vector<8x8xf32> to vector<1x8x8xf32>
    %92 = vector.extract_strided_slice %6 {offsets = [0, 24], sizes = [8, 8], strides = [1, 1]} : vector<8x32xf32> to vector<8x8xf32>
    %93 = vector.shape_cast %92 : vector<8x8xf32> to vector<1x8x8xf32>
    %94 = vector.extract_strided_slice %8 {offsets = [0, 24], sizes = [8, 8], strides = [1, 1]} : vector<8x32xf32> to vector<8x8xf32>
    %95 = vector.shape_cast %94 : vector<8x8xf32> to vector<1x8x8xf32>
    "tpu.trace_start"() <{level = 10 : i32, message = "bqd,bkd->bqk"}> : () -> ()
    %cst_52 = arith.constant dense<0.000000e+00> : vector<1x8x8xf32>
    %96 = tpu.matmul %91, %93, %cst_52 {dimension_numbers = #tpu.dot_dimension_numbers<[2], [2], [1], [1], [0, 0, 0, 1, 1, 1], [0], [0]>, precision = #tpu.contract_precision<fp32>} : vector<1x8x8xf32>, vector<1x8x8xf32>, vector<1x8x8xf32> -> vector<1x8x8xf32>
    "tpu.trace_stop"() : () -> ()
    %cst_53 = arith.constant dense<0xFF800000> : vector<1x8xf32>
    %97 = vector.multi_reduction <maximumf>, %96, %cst_53 [2] : vector<1x8x8xf32> to vector<1x8xf32>
    %98 = vector.shape_cast %97 : vector<1x8xf32> to vector<1x8x1xf32>
    %99 = vector.broadcast %98 : vector<1x8x1xf32> to vector<1x8x8xf32>
    %100 = arith.subf %96, %99 : vector<1x8x8xf32>
    %101 = math.exp %100 : vector<1x8x8xf32>
    %cst_54 = arith.constant dense<0.000000e+00> : vector<1x8xf32>
    %102 = vector.multi_reduction <add>, %101, %cst_54 [2] : vector<1x8x8xf32> to vector<1x8xf32>
    %103 = vector.shape_cast %102 : vector<1x8xf32> to vector<1x8x1xf32>
    %104 = vector.broadcast %103 : vector<1x8x1xf32> to vector<1x8x8xf32>
    %105 = arith.divf %101, %104 : vector<1x8x8xf32>
    %c3 = arith.constant 3 : index
    %c0_55 = arith.constant 0 : index
    %c0_56 = arith.constant 0 : index
    %c0_57 = arith.constant 0 : index
    %106 = vector.load %arg13[%c3, %c0_55, %c0_56, %c0_57] : memref<4x1x8x8xf32, #tpu.memory_space<vmem>>, vector<1x1x8x8xf32>
    %107 = vector.shape_cast %106 : vector<1x1x8x8xf32> to vector<1x8x8xf32>
    %108 = vector.shape_cast %105 : vector<1x8x8xf32> to vector<1x1x8x8xf32>
    tpu.vector_store %arg13[%c3, %c0_55, %c0_56, %c0_57], %108 {strides = array<i32>} : memref<4x1x8x8xf32, #tpu.memory_space<vmem>>, vector<1x1x8x8xf32>,
    "tpu.trace_start"() <{level = 10 : i32, message = "bqk,bkd->bqd"}> : () -> ()
    %cst_58 = arith.constant dense<0.000000e+00> : vector<1x8x8xf32>
    %109 = tpu.matmul %105, %95, %cst_58 {dimension_numbers = #tpu.dot_dimension_numbers<[2], [1], [1], [2], [0, 0, 0, 1, 1, 2], [0], [0]>, precision = #tpu.contract_precision<fp32>} : vector<1x8x8xf32>, vector<1x8x8xf32>, vector<1x8x8xf32> -> vector<1x8x8xf32>
    "tpu.trace_stop"() : () -> ()
    %c3_59 = arith.constant 3 : index
    %c0_60 = arith.constant 0 : index
    %c0_61 = arith.constant 0 : index
    %c0_62 = arith.constant 0 : index
    %110 = vector.load %arg12[%c3_59, %c0_60, %c0_61, %c0_62] : memref<4x1x8x8xf32, #tpu.memory_space<vmem>>, vector<1x1x8x8xf32>
    %111 = vector.shape_cast %110 : vector<1x1x8x8xf32> to vector<1x8x8xf32>
    %112 = vector.shape_cast %109 : vector<1x8x8xf32> to vector<1x1x8x8xf32>
    tpu.vector_store %arg12[%c3_59, %c0_60, %c0_61, %c0_62], %112 {strides = array<i32>} : memref<4x1x8x8xf32, #tpu.memory_space<vmem>>, vector<1x1x8x8xf32>,
    %113 = vector.shape_cast %109 : vector<1x8x8xf32> to vector<8x8xf32>
    %114 = vector.extract_strided_slice %9 {offsets = [24, 0], sizes = [8, 32], strides = [1, 1]} : vector<32x32xf32> to vector<8x32xf32>
    %cst_63 = arith.constant dense<0.000000e+00> : vector<8x32xf32>
    %115 = tpu.matmul %113, %114, %cst_63 {dimension_numbers = #tpu.dot_dimension_numbers<[1], [0], [0], [1], [0, 0, 1, 1], [], []>, precision = #tpu.contract_precision<fp32>} : vector<8x8xf32>, vector<8x32xf32>, vector<8x32xf32> -> vector<8x32xf32>
    %116 = arith.addf %89, %115 : vector<8x32xf32>
    %117 = arith.addf %0, %116 : vector<8x32xf32>
    %c0_64 = arith.constant 0 : index
    %c0_65 = arith.constant 0 : index
    %118 = vector.load %arg8[%c0_64, %c0_65] : memref<1x32xf32, #tpu.memory_space<vmem>>, vector<1x32xf32>
    %119 = vector.broadcast %118 : vector<1x32xf32> to vector<8x32xf32>
    %120 = arith.addf %117, %119 : vector<8x32xf32>
    %cst_66 = arith.constant dense<0.000000e+00> : vector<8xf32>
    %121 = vector.multi_reduction <add>, %120, %cst_66 [1] : vector<8x32xf32> to vector<8xf32>
    %122 = vector.shape_cast %121 : vector<8xf32> to vector<8x1xf32>
    %cst_67 = arith.constant 3.200000e+01 : f32
    %123 = vector.broadcast %cst_67 : f32 to vector<8x1xf32>
    %124 = arith.divf %122, %123 : vector<8x1xf32>
    %125 = vector.broadcast %124 : vector<8x1xf32> to vector<8x32xf32>
    %126 = arith.subf %120, %125 : vector<8x32xf32>
    %127 = arith.mulf %126, %126 : vector<8x32xf32>
    %cst_68 = arith.constant dense<0.000000e+00> : vector<8xf32>
    %128 = vector.multi_reduction <add>, %127, %cst_68 [1] : vector<8x32xf32> to vector<8xf32>
    %129 = vector.shape_cast %128 : vector<8xf32> to vector<8x1xf32>
    %cst_69 = arith.constant 3.100000e+01 : f32
    %130 = vector.broadcast %cst_69 : f32 to vector<8x1xf32>
    %131 = arith.divf %129, %130 : vector<8x1xf32>
    %132 = vector.broadcast %124 : vector<8x1xf32> to vector<8x32xf32>
    %133 = arith.subf %120, %132 : vector<8x32xf32>
    %134 = math.sqrt %131 : vector<8x1xf32>
    %cst_70 = arith.constant 1.000000e-03 : f32
    %135 = vector.broadcast %cst_70 : f32 to vector<8x1xf32>
    %136 = arith.addf %134, %135 : vector<8x1xf32>
    %137 = vector.broadcast %136 : vector<8x1xf32> to vector<8x32xf32>
    %138 = arith.divf %133, %137 : vector<8x32xf32>
    %c0_71 = arith.constant 0 : index
    %c0_72 = arith.constant 0 : index
    %139 = vector.load %arg9[%c0_71, %c0_72] : memref<1x32xf32, #tpu.memory_space<vmem>>, vector<1x32xf32>
    %140 = vector.broadcast %139 : vector<1x32xf32> to vector<8x32xf32>
    %141 = arith.mulf %140, %138 : vector<8x32xf32>
    %c0_73 = arith.constant 0 : index
    %c0_74 = arith.constant 0 : index
    %142 = vector.load %arg10[%c0_73, %c0_74] : memref<1x32xf32, #tpu.memory_space<vmem>>, vector<1x32xf32>
    %143 = vector.broadcast %142 : vector<1x32xf32> to vector<8x32xf32>
    %144 = arith.addf %141, %143 : vector<8x32xf32>
    %c0_75 = arith.constant 0 : index
    %c0_76 = arith.constant 0 : index
    %145 = vector.load %arg11[%c0_75, %c0_76] : memref<8x32xf32, #tpu.memory_space<vmem>>, vector<8x32xf32>
    tpu.vector_store %arg11[%c0_75, %c0_76], %144 {strides = array<i32>} : memref<8x32xf32, #tpu.memory_space<vmem>>, vector<8x32xf32>,
    return
  }
  func.func @transform_0(%arg0: i32) -> (i32, i32) {
    %c0_i32 = arith.constant 0 : i32
    %c0_i32_0 = arith.constant 0 : i32
    return %arg0, %c0_i32 : i32, i32
  }
  func.func @transform_1(%arg0: i32) -> (i32, i32) {
    %c0_i32 = arith.constant 0 : i32
    %c0_i32_0 = arith.constant 0 : i32
    return %arg0, %c0_i32 : i32, i32
  }
  func.func @transform_2(%arg0: i32) -> (i32, i32) {
    %c0_i32 = arith.constant 0 : i32
    %c0_i32_0 = arith.constant 0 : i32
    return %arg0, %c0_i32 : i32, i32
  }
  func.func @transform_3(%arg0: i32) -> (i32, i32) {
    %c0_i32 = arith.constant 0 : i32
    %c0_i32_0 = arith.constant 0 : i32
    %c0_i32_1 = arith.constant 0 : i32
    return %c0_i32, %c0_i32_0 : i32, i32
  }
  func.func @transform_4(%arg0: i32) -> (i32, i32) {
    %c0_i32 = arith.constant 0 : i32
    %c0_i32_0 = arith.constant 0 : i32
    %c0_i32_1 = arith.constant 0 : i32
    return %c0_i32, %c0_i32_0 : i32, i32
  }
  func.func @transform_5(%arg0: i32) -> (i32, i32) {
    %c0_i32 = arith.constant 0 : i32
    %c0_i32_0 = arith.constant 0 : i32
    %c0_i32_1 = arith.constant 0 : i32
    return %c0_i32, %c0_i32_0 : i32, i32
  }
  func.func @transform_6(%arg0: i32) -> (i32, i32) {
    %c0_i32 = arith.constant 0 : i32
    %c0_i32_0 = arith.constant 0 : i32
    %c0_i32_1 = arith.constant 0 : i32
    return %c0_i32, %c0_i32_0 : i32, i32
  }
  func.func @transform_7(%arg0: i32) -> (i32, i32) {
    %c0_i32 = arith.constant 0 : i32
    %c0_i32_0 = arith.constant 0 : i32
    %c0_i32_1 = arith.constant 0 : i32
    return %c0_i32, %c0_i32_0 : i32, i32
  }
  func.func @transform_8(%arg0: i32) -> (i32, i32) {
    %c0_i32 = arith.constant 0 : i32
    %c0_i32_0 = arith.constant 0 : i32
    %c0_i32_1 = arith.constant 0 : i32
    return %c0_i32, %c0_i32_0 : i32, i32
  }
  func.func @transform_9(%arg0: i32) -> (i32, i32) {
    %c0_i32 = arith.constant 0 : i32
    %c0_i32_0 = arith.constant 0 : i32
    %c0_i32_1 = arith.constant 0 : i32
    return %c0_i32, %c0_i32_0 : i32, i32
  }
  func.func @transform_10(%arg0: i32) -> (i32, i32) {
    %c0_i32 = arith.constant 0 : i32
    %c0_i32_0 = arith.constant 0 : i32
    return %arg0, %c0_i32 : i32, i32
  }
  func.func @transform_11(%arg0: i32) -> (i32, i32, i32, i32) {
    %c0_i32 = arith.constant 0 : i32
    %c0_i32_0 = arith.constant 0 : i32
    %c0_i32_1 = arith.constant 0 : i32
    %c0_i32_2 = arith.constant 0 : i32
    return %c0_i32, %arg0, %c0_i32_0, %c0_i32_1 : i32, i32, i32, i32
  }
  func.func @transform_12(%arg0: i32) -> (i32, i32, i32, i32) {
    %c0_i32 = arith.constant 0 : i32
    %c0_i32_0 = arith.constant 0 : i32
    %c0_i32_1 = arith.constant 0 : i32
    %c0_i32_2 = arith.constant 0 : i32
    return %c0_i32, %arg0, %c0_i32_0, %c0_i32_1 : i32, i32, i32, i32
  }
}

</mosaic_0001>

<bundles_post_ra>
// kernel: tpu_custom_call.1
= control target key start
LH: loop header
LB: loop body
LE: loop exit
PB: predicated region body
PF: predicated region fallthrough
CT: control target
= control target key end

     0   :  { %s10442_s0 = inlined_call_operand.hbm [shape: f32[16,32], index: 0, kind: input, shape index: {}]   ;;  %s10443_s1 = inlined_call_operand.hbm [shape: f32[16,32], index: 1, kind: input, shape index: {}]   ;;  %s10444_s2 = inlined_call_operand.hbm [shape: f32[16,32], index: 2, kind: input, shape index: {}]   ;;  %s10445_s3 = inlined_call_operand.hbm [shape: f32[32,32], index: 3, kind: input, shape index: {}]   ;;  %s10446_s4 = inlined_call_operand.hbm [shape: f32[32,32], index: 4, kind: input, shape index: {}]   ;;  %s10447_s5 = inlined_call_operand.hbm [shape: f32[32,32], index: 5, kind: input, shape index: {}]   ;;  %s10448_s6 = inlined_call_operand.hbm [shape: f32[32,32], index: 6, kind: input, shape index: {}]   ;;  %s10449_s7 = inlined_call_operand.vmem [shape: f32[1,32], index: 7, kind: input, shape index: {}]   ;;  %s10450_s8 = inlined_call_operand.vmem [shape: f32[1,32], index: 8, kind: input, shape index: {}]   ;;  %s10451_s9 = inlined_call_operand.vmem [shape: f32[1,32], index: 9, kind: input, shape index: {}]   ;;  %s10452_s10 = inlined_call_operand.hbm [shape: f32[16,32], index: 10, kind: output, shape index: {0}]   ;;  %s10453_s11 = inlined_call_operand.hbm [shape: f32[4,2,8,8], index: 11, kind: output, shape index: {1}]   ;;  %s10454_s12 = inlined_call_operand.hbm [shape: f32[4,2,8,8], index: 12, kind: output, shape index: {2}]  }
   0x1   :  { %10484 = sst [smem:[#allocation30_spill]] %s10443_s1 }
   0x2   :  { %10485 = sst [smem:[#allocation31_spill]] %s10445_s3 }
   0x3   :  { %10486 = sst [smem:[#allocation32_spill]] %s10447_s5 }
   0x4   :  { %10487 = sst [smem:[#allocation33_spill]] %s10450_s8 }
   0x5   :  { %10488 = sst [smem:[#allocation34_spill]] %s10451_s9 }
   0x6   :  { %10489 = sst [smem:[#allocation35_spill]] %s10452_s10 }
   0x7   :  { %10490 = sst [smem:[#allocation36_spill]] %s10453_s11 }
   0x8   :  { %10491 = sst [smem:[#allocation37_spill]] %s10454_s12 }
   0x9   :  { %18 = vsyncpa [#allocation3], 0 }
   0xa   :  { %20 = vsyncpa [#allocation3 + $0x1], 0 }
   0xb   :  { %21 = vsyncpa [#allocation6], 0 }
   0xc   :  { %23 = vsyncpa [#allocation6 + $0x1], 0 }
   0xd   :  { %24 = vsyncpa [#allocation9], 0 }
   0xe   :  { %25 = vsyncpa [#allocation12], 0 }
   0xf   :  { %26 = vsyncpa [#allocation4], 0 }
  0x10   :  { %28 = vsyncpa [#allocation4 + $0x1], 0 }
  0x11   :  { %29 = vsyncpa [#allocation16], 0 }
  0x12   :  { %31 = vsyncpa [#allocation16 + $0x1], 0  ;;  %s9469_s21 = smov 0   ;;  %s9471_s22 = smov 0  }
  0x13   :  { %s9473_s23 = smov 0   ;;  %s9475_s24 = smov 0  }
  0x14 LB: > { %10492 = sst [smem:[#allocation24_spill]] %s9369_s21  ;;  %s9383_s25 = smov [#allocation8]   ;;  %s9381_s24 = sphi %s9475_s24, %s10536_s24   ;;  %s9377_s23 = sphi %s9473_s23, %s10540_s23   ;;  %s9373_s22 = sphi %s9471_s22, %s10539_s22   ;;  %s9369_s21 = sphi %s9469_s21, %s10538_s21  }
  0x15   : > { %10493 = sst [smem:[#allocation25_spill]] %s9381_s24  ;;  %s357_s26 = sshll.u32 %s9383_s25, 4  ;;  %s9495_s26 = int_to_ptr.vmem [resolvable:$true] %s357_s26 }
  0x16   : > { %s9490_s27 = sadd.s32 4294967295, %s9381_s24   ;;  %p7852_p0 = scmp.ge.s32.totalorder %s9381_s24, 1 }
  0x17   : > { %p10469_p1 = scmp.eq.s32.totalorder %s9490_s27, 0  ;;  %p345_p2 = scmp.lt.s32.totalorder %s9381_s24, 3 }
  0x18   : > { %s9384_s29 = smov [#allocation11]   ;;  %s10496_s3 = sld [smem:[#allocation31_spill]] }
  0x19   : > { %p9497_p3 = pnand %p7852_p0, %p345_p2  ;;  %s383_s30 = sshll.u32 %s9384_s29, 4  ;;  %s9510_s30 = int_to_ptr.vmem [resolvable:$true] %s383_s30 }
  0x1b   : > { %s10494_s28 = scalar_select %p9497_p3, 1, 0 }
  0x1c   : > { %p8930_p5 = pneg %p9497_p3 }
  0x1e   : > { %p9506_p6 = pnand %p8930_p5, %p10469_p1  ;;  %s9041_s16 = scalar_lea.hbm %s10496_s3, 512 }
  0x1f   : > { %p9042_p7 = scmp.ne.s32.totalorder %s10496_s3, %s9041_s16  ;;  %p9048_p11 = scmp.lt.u32.totalorder %s9041_s16, %s10496_s3 }
  0x20   : > { %s10495_s13 = scalar_select %p9506_p6, 1, 0 }
  0x21   : > { %p9520_p8 = pneg %p9506_p6 }
  0x23   : > { %s10497_s19 = scalar_select %p9520_p8, 1, 0 }
  0x24   : > { %p9044_p9 = pnand %p9520_p8, %p9042_p7 }
  0x26   : > { %p9045_p10 = pneg %p9044_p9 }
  0x28   : > { %p9050_p12 = pnand %p9048_p11, %p9045_p10 }
  0x2a   : > { %9053 = shalt.err (!%p9050_p12)
}
  0x2b   : > { %s9054_s29 = scalar_lea.vmem %s9495_s26, 512  ;;  %p9062_p5 = scmp.lt.s32.totalorder %s9495_s26, %s9495_s26 }
  0x2c   : > { %p9055_p13 = scmp.ne.s32.totalorder %s9495_s26, %s9054_s29  ;;  %p9063_p4 = scmp.lt.s32.totalorder %s9054_s29, %s9054_s29 }
  0x2e   : > { %p9057_p0 = pnand %p9055_p13, %p9520_p8  ;;  %p9064_p7 = por %p9063_p4, %p9062_p5 }
  0x30   : > { %p9058_p2 = pneg %p9057_p0 }
  0x32   : > { %p9065_p9 = pnand %p9064_p7, %p9058_p2 }
  0x34   : > { %9068 = shalt.err (!%p9065_p9)
}
  0x35   : > { %s10458_s14 = smov 128   ;;  %s10460_s15 = smov 8  }
  0x36   : > { %8933 = dma.hbm_to_vmem [thread:$0]  (!%p9506_p6), %s10496_s3, 512, %s9495_s26, [#allocation9], %s10458_s14, %s10458_s14, %s10460_s15  }
  0x37   : > { %s10498_s5 = sld [smem:[#allocation32_spill]] }
  0x3d   : > { %s9069_s25 = scalar_lea.hbm %s10498_s5, 512 }
  0x3e   : > { %p9070_p4 = scmp.ne.s32.totalorder %s10498_s5, %s9069_s25  ;;  %p9076_p12 = scmp.lt.u32.totalorder %s9069_s25, %s10498_s5 }
  0x40   : > { %p9072_p10 = pnand %p9070_p4, %p9520_p8 }
  0x42   : > { %p9073_p11 = pneg %p9072_p10 }
  0x44   : > { %p9078_p13 = pnand %p9076_p12, %p9073_p11 }
  0x46   : > { %9081 = shalt.err (!%p9078_p13)
}
  0x47   : > { %s9082_s26 = scalar_lea.vmem %s9510_s30, 512  ;;  %p9090_p7 = scmp.lt.s32.totalorder %s9510_s30, %s9510_s30 }
  0x48   : > { %p9083_p0 = scmp.ne.s32.totalorder %s9510_s30, %s9082_s26  ;;  %p9091_p9 = scmp.lt.s32.totalorder %s9082_s26, %s9082_s26 }
  0x4a   : > { %p9085_p2 = pnand %p9083_p0, %p9520_p8  ;;  %p9092_p4 = por %p9091_p9, %p9090_p7 }
  0x4c   : > { %p9086_p5 = pneg %p9085_p2 }
  0x4e   : > { %p9093_p10 = pnand %p9092_p4, %p9086_p5 }
  0x50   : > { %9096 = shalt.err (!%p9093_p10)
}
  0x51   : > { %8939 = dma.hbm_to_vmem [thread:$0]  (!%p9506_p6), %s10498_s5, 512, %s9510_s30, [#allocation12], %s10458_s14, %s10458_s14, %s10460_s15  }
  0x52   : > { %s10457_s10 = sadd.s32 4294967294, %s9381_s24   ;;  %s9572_s16 = sadd.s32 1, %s9381_s24  }
  0x53   : > { %10499 = sst [smem:[#allocation26_spill]] %s9572_s16  ;;  %s41_s17 = ssub.s32 %s9381_s24, %s9572_s16 }
  0x54   : > { %s44_s18 = sadd.s32 1, %s9377_s23  ;;  %p42_p11 = scmp.eq.s32.totalorder %s41_s17, 0 }
  0x55   : > { %p51_p12 = scmp.ne.s32.totalorder %s9377_s23, %s9373_s22  ;;  %p52_p13 = scmp.eq.s32.totalorder %s9381_s24, 0 }
  0x56   : > { %p57_p0 = scmp.ne.s32.totalorder %s9373_s22, %s9369_s21  ;;  %p280_p7 = scmp.eq.s32.totalorder %s9490_s27, 1 }
  0x57   : > { %s9583_s20 = scalar_select %p42_p11, %s9377_s23, %s44_s18  }
  0x58   : > { %p53_p2 = por %p52_p13, %p51_p12  ;;  %p9587_p5 = por %p10469_p1, %p57_p0 }
  0x59   : > { %10500 = sst [smem:[#allocation27_spill]] %s9583_s20  ;;  %p286_p9 = scmp.eq.s32.totalorder %s10457_s10, 1 }
  0x5a   : > { %s10501_s25 = scalar_select %p9587_p5, 1, 0 }
  0x5b   : > { %p8967_p4 = scmp.lt.s32.totalorder %s9381_s24, 2  ;;  %s10462_s30 = sand.u32 1, %s9377_s23  }
  0x5c   : > { %p9596_p10 = por %p280_p7, %p51_p12  ;;  %p9600_p3 = por %p286_p9, %p57_p0 }
  0x5d   : > { %s9606_s8 = sshll.u32 %s10462_s30, 3  ;;  %s9609_s9 = sshll.u32 %s9381_s24, 7 }
  0x5e   : > { %s10502_s29 = scalar_select %p9596_p10, 1, 0 }
  0x5f   : > { %s10504_s26 = scalar_select %p9600_p3, 1, 0 }
  0x60   : > { %10503 = sst [smem:[#allocation28_spill]] %s10502_s29  ;;  %p9611_p11 = pnand %p8967_p4, %p53_p2 }
  0x61   : > { %10505 = sst [smem:[#allocation29_spill]] %s10504_s26  ;;  %s437_s18 = sand.u32 1, %s9381_s24  }
  0x62   : > { %s10506_s17 = scalar_select %p9611_p11, 1, 0 }
  0x63   : > { %s10507_s1 = sld [smem:[#allocation30_spill]]  ;;  %s441_s30 = scalar_lea.vmem [#allocation5], %s9606_s8 }
  0x64   : > { %s448_s3 = sshll.u32 %s441_s30, 4  ;;  %s9387_s5 = smov [#allocation10]   ;;  %s9623_s3 = int_to_ptr.vmem [resolvable:$true] %s448_s3 }
  0x65   : > { %s9625_s20 = sshll.u32 %s9387_s5, 4  ;;  %s9627_s16 = scalar_lea.sflag [#allocation6], %s437_s18  ;;  %s371_s20 = int_to_ptr.vmem [resolvable:$true] %s9625_s20 }
  0x66   : > { %p9633_p13 = pneg %p9611_p11 }
  0x68   : > { %s10508_s14 = scalar_select %p9633_p13, 1, 0 }
  0x69   : > { %s9620_s15 = scalar_lea.hbm %s10507_s1, %s9609_s9  ;;  %s9102_s24 = scalar_lea.hbm %s10507_s1, 256 }
  0x6a   : > { %s9097_s26 = scalar_lea.hbm %s9620_s15, 128  ;;  %p9103_p7 = scmp.lt.u32.totalorder %s9620_s15, %s10507_s1 }
  0x6b   : > { %p9098_p12 = scmp.ne.s32.totalorder %s9620_s15, %s9097_s26  ;;  %p9104_p9 = scmp.lt.u32.totalorder %s9102_s24, %s9097_s26 }
  0x6c   : > { %p9106_p1 = scmp.lt.u32.totalorder %s9097_s26, %s9620_s15 }
  0x6d   : > { %p9100_p0 = pnand %p9633_p13, %p9098_p12  ;;  %p9105_p4 = por %p9104_p9, %p9103_p7 }
  0x6f   : > { %p9101_p2 = pneg %p9100_p0  ;;  %p9107_p3 = por %p9106_p1, %p9105_p4 }
  0x71   : > { %p9108_p10 = pnand %p9107_p3, %p9101_p2 }
  0x73   : > { %9111 = shalt.err (!%p9108_p10)
}
  0x74   : > { %s9112_s18 = scalar_lea.vmem %s9623_s3, 128  ;;  %s9388_s10 = smov [#allocation5]  }
  0x75   : > { %p9113_p12 = scmp.ne.s32.totalorder %s9623_s3, %s9112_s18  ;;  %s9117_s30 = sshll.u32 %s9388_s10, 4  ;;  %s9118_s30 = int_to_ptr.vmem [resolvable:$false] %s9117_s30 }
  0x76   : > { %s9119_s21 = scalar_lea.vmem %s9118_s30, 256  ;;  %p9120_p6 = scmp.lt.s32.totalorder %s9623_s3, %s9118_s30 }
  0x77   : > { %p9115_p0 = pnand %p9113_p12, %p9633_p13  ;;  %p9121_p8 = scmp.lt.s32.totalorder %s9119_s21, %s9112_s18 }
  0x79   : > { %p9116_p5 = pneg %p9115_p0  ;;  %p9122_p7 = por %p9121_p8, %p9120_p6 }
  0x7b   : > { %p9123_p9 = pnand %p9122_p7, %p9116_p5 }
  0x7d   : > { %9126 = shalt.err (!%p9123_p9)
}
  0x7e   : > { %8949 = dma.hbm_to_vmem [thread:$0]  (!%p9611_p11), %s9620_s15, 128, %s9623_s3, %s9627_s16  }
  0x7f   : > { %s9127_s5 = scalar_lea.hbm %s10446_s4, 512  ;;  %p10509_p3 = scmp.ne.s32.totalorder %s10497_s19, 0 }
  0x80   : > { %p9128_p1 = scmp.ne.s32.totalorder %s10446_s4, %s9127_s5  ;;  %p9134_p5 = scmp.lt.u32.totalorder %s9127_s5, %s10446_s4 }
  0x82   : > { %p9130_p6 = pnand %p9128_p1, %p10509_p3 }
  0x84   : > { %p9131_p8 = pneg %p9130_p6 }
  0x86   : > { %p9136_p10 = pnand %p9134_p5, %p9131_p8 }
  0x88   : > { %9139 = shalt.err (!%p9136_p10)
}
  0x89   : > { %s9140_s21 = scalar_lea.vmem %s371_s20, 512  ;;  %p9148_p0 = scmp.lt.s32.totalorder %s371_s20, %s371_s20 }
  0x8a   : > { %p9141_p2 = scmp.ne.s32.totalorder %s371_s20, %s9140_s21  ;;  %p9149_p7 = scmp.lt.s32.totalorder %s9140_s21, %s9140_s21 }
  0x8c   : > { %p9143_p4 = pnand %p9141_p2, %p10509_p3  ;;  %p9150_p9 = por %p9149_p7, %p9148_p0 }
  0x8e   : > { %p9144_p12 = pneg %p9143_p4 }
  0x90   : > { %p9151_p11 = pnand %p9150_p9, %p9144_p12 }
  0x92   : > { %9154 = shalt.err (!%p9151_p11)
}
  0x93   : > { %p10510_p1 = scmp.ne.s32.totalorder %s10495_s13, 0  ;;  %s10511_s1 = smov 8  }
  0x94   : > { %s10512_s3 = smov 128   ;;  %s9389_s26 = smov [#allocation13]  }
  0x95   : > { %8936 = dma.hbm_to_vmem [thread:$0]  (!%p10510_p1), %s10446_s4, 512, %s371_s20, [#allocation9], %s10512_s3, %s10512_s3, %s10511_s1  }
  0x96   : > { %s396_s5 = sshll.u32 %s9389_s26, 4  ;;  %s9155_s30 = scalar_lea.hbm %s10448_s6, 512  ;;  %s397_s5 = int_to_ptr.vmem [resolvable:$true] %s396_s5 }
  0x97   : > { %p9156_p11 = scmp.ne.s32.totalorder %s10448_s6, %s9155_s30  ;;  %p9162_p5 = scmp.lt.u32.totalorder %s9155_s30, %s10448_s6 }
  0x99   : > { %p9158_p6 = pnand %p9156_p11, %p10509_p3 }
  0x9b   : > { %p9159_p8 = pneg %p9158_p6 }
  0x9d   : > { %p9164_p10 = pnand %p9162_p5, %p9159_p8 }
  0x9f   : > { %9167 = shalt.err (!%p9164_p10)
}
  0xa0   : > { %s9168_s20 = scalar_lea.vmem %s397_s5, 512  ;;  %p9176_p0 = scmp.lt.s32.totalorder %s397_s5, %s397_s5 }
  0xa1   : > { %p9169_p2 = scmp.ne.s32.totalorder %s397_s5, %s9168_s20  ;;  %p9177_p7 = scmp.lt.s32.totalorder %s9168_s20, %s9168_s20 }
  0xa3   : > { %p9171_p4 = pnand %p9169_p2, %p10509_p3  ;;  %p9178_p9 = por %p9177_p7, %p9176_p0 }
  0xa5   : > { %p9172_p12 = pneg %p9171_p4 }
  0xa7   : > { %p9179_p13 = pnand %p9178_p9, %p9172_p12 }
  0xa9   : > { %9182 = shalt.err (!%p9179_p13)
}
  0xaa   : > { %8942 = dma.hbm_to_vmem [thread:$0]  (!%p10510_p1), %s10448_s6, 512, %s397_s5, [#allocation12], %s10512_s3, %s10512_s3, %s10511_s1  }
  0xab   : > { %s9704_s15 = scalar_lea.hbm %s10442_s0, %s9609_s9  ;;  %s423_s13 = scalar_lea.vmem [#allocation2], %s9606_s8 }
  0xac   : > { %s430_s24 = sshll.u32 %s423_s13, 4  ;;  %s10513_s26 = sand.u32 1, %s9377_s23   ;;  %s431_s24 = int_to_ptr.vmem [resolvable:$true] %s430_s24 }
  0xad   : > { %s420_s10 = scalar_lea.sflag [#allocation3], %s10513_s26  ;;  %s9183_s18 = scalar_lea.hbm %s9704_s15, 128 }
  0xae   : > { %p9184_p13 = scmp.ne.s32.totalorder %s9704_s15, %s9183_s18  ;;  %p10514_p3 = scmp.ne.s32.totalorder %s10508_s14, 0 }
  0xaf   : > { %s9188_s5 = scalar_lea.hbm %s10442_s0, 256  ;;  %p9189_p1 = scmp.lt.u32.totalorder %s9704_s15, %s10442_s0 }
  0xb0   : > { %p9186_p11 = pnand %p9184_p13, %p10514_p3  ;;  %p9190_p8 = scmp.lt.u32.totalorder %s9188_s5, %s9183_s18 }
  0xb1   : > { %p9192_p10 = scmp.lt.u32.totalorder %s9183_s18, %s9704_s15 }
  0xb2   : > { %p9187_p6 = pneg %p9186_p11  ;;  %p9191_p5 = por %p9190_p8, %p9189_p1 }
  0xb4   : > { %p9193_p2 = por %p9192_p10, %p9191_p5 }
  0xb6   : > { %p9194_p4 = pnand %p9193_p2, %p9187_p6 }
  0xb8   : > { %9197 = shalt.err (!%p9194_p4)
}
  0xb9   : > { %s9198_s20 = scalar_lea.vmem %s431_s24, 128  ;;  %s9390_s11 = smov [#allocation2]  }
  0xba   : > { %p9199_p12 = scmp.ne.s32.totalorder %s431_s24, %s9198_s20  ;;  %s9203_s12 = sshll.u32 %s9390_s11, 4  ;;  %s9204_s12 = int_to_ptr.vmem [resolvable:$false] %s9203_s12 }
  0xbb   : > { %s9205_s19 = scalar_lea.vmem %s9204_s12, 256  ;;  %p9206_p9 = scmp.lt.s32.totalorder %s431_s24, %s9204_s12 }
  0xbc   : > { %p9201_p0 = pnand %p9199_p12, %p10514_p3  ;;  %p9207_p13 = scmp.lt.s32.totalorder %s9205_s19, %s9198_s20 }
  0xbe   : > { %p9202_p7 = pneg %p9201_p0  ;;  %p9208_p11 = por %p9207_p13, %p9206_p9 }
  0xc0   : > { %p9209_p1 = pnand %p9208_p11, %p9202_p7 }
  0xc2   : > { %9212 = shalt.err (!%p9209_p1)
}
  0xc3   : > { %p10515_p8 = scmp.ne.s32.totalorder %s10506_s17, 0  ;;  %s9730_s26 = scalar_lea.hbm %s10444_s2, %s9609_s9 }
  0xc4   : > { %s459_s18 = scalar_lea.vmem [#allocation7], %s9606_s8  ;;  %s9213_s3 = scalar_lea.hbm %s9730_s26, 128 }
  0xc5   : > { %8946 = dma.hbm_to_vmem [thread:$0]  (!%p10515_p8), %s9704_s15, 128, %s431_s24, %s420_s10  }
  0xc6   : > { %s466_s1 = sshll.u32 %s459_s18, 4  ;;  %p9214_p6 = scmp.ne.s32.totalorder %s9730_s26, %s9213_s3  ;;  %s467_s1 = int_to_ptr.vmem [resolvable:$true] %s466_s1 }
  0xc7   : > { %s9218_s15 = scalar_lea.hbm %s10444_s2, 256  ;;  %p9219_p2 = scmp.lt.u32.totalorder %s9730_s26, %s10444_s2 }
  0xc8   : > { %p9216_p5 = pnand %p9214_p6, %p10514_p3  ;;  %p9220_p4 = scmp.lt.u32.totalorder %s9218_s15, %s9213_s3 }
  0xc9   : > { %p9222_p0 = scmp.lt.u32.totalorder %s9213_s3, %s9730_s26 }
  0xca   : > { %p9217_p10 = pneg %p9216_p5  ;;  %p9221_p12 = por %p9220_p4, %p9219_p2 }
  0xcc   : > { %p9223_p7 = por %p9222_p0, %p9221_p12 }
  0xce   : > { %p9224_p9 = pnand %p9223_p7, %p9217_p10 }
  0xd0   : > { %9227 = shalt.err (!%p9224_p9)
}
  0xd1   : > { %s9228_s8 = scalar_lea.vmem %s467_s1, 128  ;;  %s9391_s9 = smov [#allocation7]  }
  0xd2   : > { %p9229_p13 = scmp.ne.s32.totalorder %s467_s1, %s9228_s8  ;;  %s9233_s21 = sshll.u32 %s9391_s9, 4  ;;  %s9234_s21 = int_to_ptr.vmem [resolvable:$false] %s9233_s21 }
  0xd3   : > { %s9235_s20 = scalar_lea.vmem %s9234_s21, 256  ;;  %p9236_p6 = scmp.lt.s32.totalorder %s467_s1, %s9234_s21 }
  0xd4   : > { %p9231_p11 = pnand %p9229_p13, %p10514_p3  ;;  %p9237_p5 = scmp.lt.s32.totalorder %s9235_s20, %s9228_s8 }
  0xd6   : > { %p9232_p1 = pneg %p9231_p11  ;;  %p9238_p8 = por %p9237_p5, %p9236_p6 }
  0xd8   : > { %p9239_p2 = pnand %p9238_p8, %p9232_p1 }
  0xda   : > { %9242 = shalt.err (!%p9239_p2)
}
  0xdb   : > { %p10516_p4 = scmp.ne.s32.totalorder %s10506_s17, 0  ;;  %p10517_p10 = scmp.ne.s32.totalorder %s10494_s28, 0 }
  0xdc   : > { %s9754_s14 = sand.u32 (!%p10517_p10), 1, %s9373_s22   ;;  %p10518_p3 = scmp.ne.s32.totalorder (!%p10517_p10), %s10501_s25, 0 }
  0xdd   : > { %8952 = dma.hbm_to_vmem [thread:$0]  (!%p10516_p4), %s9730_s26, 128, %s467_s1, %s9627_s16  }
  0xde   : > { %475 = sbr.rel (%p10517_p10) target bundleno = 3768 (0xeb8), region = 60  ;;  %s9757_s11 = sshll.u32 (!%p10517_p10), %s9754_s14, 3 }
  0xdf   : > { %s478_s12 = scalar_lea.sflag (!%p10517_p10), [#allocation3], %s9754_s14  ;;  %s481_s19 = scalar_lea.vmem (!%p10517_p10), [#allocation2], %s9757_s11 }
  0xe5   : > { %9344 = dma.done.wait (%p10518_p3), %s478_s12, 128  }
  0xe6   : > { %9346 = vsyncadd (%p10518_p3), %s478_s12, 4294967168  ;;  %s486_s28 = sand.u32 1, %s9490_s27   ;;  %s490_s17 = scalar_lea.vmem [#allocation5], %s9757_s11 }
  0xe7   : > { %s487_s16 = scalar_lea.sflag [#allocation6], %s486_s28 }
  0xe8   : > { %9348 = dma.done.wait (%p10518_p3), %s487_s16, 256  }
  0xe9   : > { %9350 = vsyncadd (%p10518_p3), %s487_s16, 4294967040  ;;  %s499_s29 = scalar_lea.vmem [#allocation7], %s9757_s11  ;;  %p10519_p8 = scmp.eq.s32.totalorder %s9490_s27, 0 }
  0xeb   : > { %9352 = dma.done.wait (%p10519_p8), [#allocation9], 1024   ;;  %p10520_p12 = pmov %p10519_p8 }
  0xec   : > { %p10521_p0 = pmov %p10519_p8 }
  0xed   : > { %9354 = vsyncadd (%p10520_p12), [#allocation9], 4294966272 }
  0xee   : > { %9356 = dma.done.wait (%p10521_p0), [#allocation12], 1024   ;;  %p10522_p7 = pmov %p10521_p0 }
  0xef   : > { %v9392_v0 = vmov 0.0|0.0   ;;  %vm9393_vm0 = vmmov 0   ;;  %v9394_v1 = vmov 0.0   ;;  %v579_v2 = vld [vmem:[#allocation8] sm:$0xff]  ;;  %v580_v3 = vld [vmem:[#allocation8 + $0x8] sm:$0xff]  ;;  %vm583_vm1 = vcmask 261120  }
  0xf0   : > { %9358 = vsyncadd (%p10522_p7), [#allocation12], 4294966272  ;;  %8684 = vmatprep.subr.bf16.mxu0 %v9392_v0  ;;  %8720 = vmatprep.subr.bf16.mxu1 %v9392_v0  ;;  %v1072_v4 = vld [vmem:[#allocation10] sm:$0xff]  ;;  %v588_v5 = vand.u32 4294901760, %v579_v2  ;;  %v591_v6 = vand.u32 4294901760, %v580_v3  ;;  %v1073_v7 = vld [vmem:[#allocation10 + $0x8] sm:$0xff] }
  0xf1   : > { %8134 = vmatprep.mubr.msk.f32.mxu0 %vm9393_vm0, %v9394_v1  ;;  %8200 = vmatprep.mubr.msk.f32.mxu1 %vm9393_vm0, %v9394_v1  ;;  %v1080_v8 = vand.u32 4294901760, %v1072_v4  ;;  %v581_v9 = vld [vmem:[#allocation8 + $0x10] sm:$0xff]  ;;  %v582_v10 = vld [vmem:[#allocation8 + $0x18] sm:$0xff]  ;;  %v1083_v11 = vand.u32 4294901760, %v1073_v7  ;;  %v577_v21 = vld [vmem:[%s490_s17] sm:$0xff]  ;;  %vm2060_vm2 = vcmask 64512  }
  0xf2   : > { %v594_v12 = vand.u32 4294901760, %v581_v9  ;;  %v597_v13 = vand.u32 4294901760, %v582_v10  ;;  %v1074_v14 = vld [vmem:[#allocation10 + $0x10] sm:$0xff]  ;;  %v1075_v15 = vld [vmem:[#allocation10 + $0x18] sm:$0xff]  ;;  %v9790_v17 = vpack.c.bf16 %v591_v6, %v588_v5  ;;  %v9792_v18 = vsub.f32 %v579_v2, %v588_v5  ;;  %s9395_s25 = smov 120   ;;  %s9396_s13 = smov 112  }
  0xf3   : > { %v576_v16 = vld [vmem:[%s481_s19] sm:$0xff]  ;;  %v9794_v19 = vsub.f32 %v580_v3, %v591_v6  ;;  %v9796_v20 = vsub.f32 %v1072_v4, %v1080_v8  ;;  %v9800_v22 = vpack.c.bf16 %v1083_v11, %v1080_v8  ;;  %v9802_v23 = vsub.f32 %v1073_v7, %v1083_v11  ;;  %s7873_s26 = sshll.u32 %s9754_s14, 5  ;;  %s9397_s3 = smov 104  }
  0xf4   : > { %v9804_v24 = vpack.c.bf16 %v597_v13, %v594_v12  ;;  %v9806_v25 = vsub.f32 %v581_v9, %v594_v12  ;;  %8686 = vmatpush3.bf16.msra.mxu0 %v9790_v17  ;;  %v9809_v26 = vsub.f32 %v582_v10, %v597_v13  ;;  %v1086_v27 = vand.u32 4294901760, %v1074_v14  ;;  %s10066_s18 = scalar_lea.vmem [#allocation17], %s7873_s26  ;;  %s10114_s1 = scalar_lea.vmem [#allocation15], %s7873_s26 }
  0xf5   : > { %v1089_v28 = vand.u32 4294901760, %v1075_v15  ;;  %v585_v29 = vsel %vm583_vm1, %v576_v16, 0  ;;  %8722 = vmatpush3.bf16.msra.mxu1 %v9800_v22  ;;  %8687 = vmatprep.subr.bf16.mxu0 %v9392_v0  ;;  %v1077_v31 = vsel %vm583_vm1, %v577_v21, 0  ;;  %v669_v32 = vand.u32 4294901760, %v9792_v18  ;;  %s10523_s15 = sld [smem:[#allocation28_spill]]  ;;  %s7621_s24 = sshll.u32 %s10114_s1, 4  ;;  %s10310_s24 = int_to_ptr.vmem [resolvable:$true] %s7621_s24 }
  0xf6   : > { %v9814_v30 = vand.u32 4294901760, %v585_v29  ;;  %v676_v33 = vand.u32 4294901760, %v9794_v19  ;;  %8723 = vmatprep.subr.bf16.mxu1 %v9392_v0  ;;  %v9822_v35 = vsub.f32 %v1074_v14, %v1086_v27  ;;  %v9826_v37 = vand.u32 4294901760, %v1077_v31  ;;  %s7636_s10 = sshll.u32 %s10066_s18, 4  ;;  %s10315_s8 = sshll.u32 %s9490_s27, 7  ;;  %s10312_s10 = int_to_ptr.vmem [resolvable:$true] %s7636_s10 }
  0xf7   : > { %v9820_v34 = vpack.c.bf16 %v1089_v28, %v1086_v27  ;;  %v9824_v36 = vsub.f32 %v1075_v15, %v1089_v28  ;;  %v670_v39 = vsub.f32 %v9792_v18, %v669_v32  ;;  %v1161_v41 = vand.u32 4294901760, %v9796_v20  ;;  %v1566_v28 = vld [vmem:[#allocation11 + $0x10] sm:$0xff]  ;;  %s10524_s20 = sld [smem:[#allocation36_spill]]  ;;  %s9243_s16 = scalar_lea.vmem %s10310_s24, 512 }
  0xf8   : > { %v9829_v38 = vsub.f32 %v585_v29, %v9814_v30  ;;  %v677_v40 = vsub.f32 %v9794_v19, %v676_v33  ;;  %8689 = vmatpush3.bf16.msra.mxu0 %v9804_v24  ;;  %v9840_v42 = vsub.f32 %v1077_v31, %v9826_v37  ;;  %v1168_v43 = vand.u32 4294901760, %v9802_v23  ;;  %v1567_v29 = vld [vmem:[#allocation11 + $0x18] sm:$0xff]  ;;  %p9244_p9 = scmp.ne.s32.totalorder %s10310_s24, %s9243_s16  ;;  %s9398_s17 = smov [#allocation15]  }
  0xf9   : > { %v683_v44 = vand.u32 4294901760, %v9806_v25  ;;  %v690_v45 = vand.u32 4294901760, %v9809_v26  ;;  %8725 = vmatpush3.bf16.msra.mxu1 %v9820_v34  ;;  %8690 = vmatprep.subr.bf16.mxu0 %v9392_v0  ;;  %v671_v47 = vand.u32 4294901760, %v670_v39  ;;  %v1162_v49 = vsub.f32 %v9796_v20, %v1161_v41 }
  0xfa   : > { %v658_v46 = vand.u32 4294901760, %v9829_v38  ;;  %v678_v48 = vand.u32 4294901760, %v677_v40  ;;  %v1150_v50 = vand.u32 4294901760, %v9840_v42  ;;  %8726 = vmatprep.subr.bf16.mxu1 %v9392_v0  ;;  %v1169_v51 = vsub.f32 %v9802_v23, %v1168_v43 }
  0xfb   : > { %v684_v52 = vsub.f32 %v9806_v25, %v683_v44  ;;  %v691_v53 = vsub.f32 %v9809_v26, %v690_v45  ;;  %v1163_v56 = vand.u32 4294901760, %v1162_v49  ;;  %v1175_v57 = vand.u32 4294901760, %v9822_v35  ;;  %p10525_p13 = scmp.ne.s32.totalorder %s10523_s15, 0 }
  0xfc   : > { %v659_v54 = vsub.f32 %v9829_v38, %v658_v46  ;;  %v8691_v55 = vpack.c.bf16 %v678_v48, %v671_v47  ;;  %v1151_v58 = vsub.f32 %v9840_v42, %v1150_v50  ;;  %v1170_v59 = vand.u32 4294901760, %v1169_v51 }
  0xfd   : > { %v685_v60 = vand.u32 4294901760, %v684_v52  ;;  %v692_v61 = vand.u32 4294901760, %v691_v53  ;;  %v1176_v63 = vsub.f32 %v9822_v35, %v1175_v57  ;;  %v1182_v2 = vand.u32 4294901760, %v9824_v36  ;;  %s10321_s12 = scalar_lea.hbm %s10524_s20, %s10315_s8  ;;  %p9245_p11 = pnand %p9244_p9, %p10525_p13 }
  0xfe   : > { %v660_v62 = vand.u32 4294901760, %v659_v54  ;;  %v1152_v3 = vand.u32 4294901760, %v1151_v58  ;;  %v8727_v4 = vpack.c.bf16 %v1170_v59, %v1163_v56  ;;  %v8697_v10 = vpack.c.bf16 %v9794_v19, %v9792_v18  ;;  %v1565_v19 = vld [vmem:[#allocation11 + $0x8] sm:$0xff] }
  0xff   : > { %v1177_v5 = vand.u32 4294901760, %v1176_v63  ;;  %v1183_v6 = vsub.f32 %v9824_v36, %v1182_v2  ;;  %v8694_v7 = vpack.c.bf16 %v692_v61, %v685_v60  ;;  %v8733_v11 = vpack.c.bf16 %v9802_v23, %v9796_v20  ;;  %v578_v20 = vld [vmem:[%s499_s29] sm:$0xff]  ;;  %p9246_p1 = pneg %p9245_p11  ;;  %s9247_s29 = sshll.u32 %s9398_s17, 4  ;;  %s9248_s29 = int_to_ptr.vmem [resolvable:$false] %s9247_s29 }
 0x100   : > { %8135 = vmatmul.mubr.f32.vlgmr.msra.gmra.mrb[0].mxu0 %v660_v62  ;;  %8201 = vmatmul.mubr.f32.vlgmr.msra.gmra.mrb[0].mxu1 %v1152_v3  ;;  %v8700_v12 = vpack.c.bf16 %v9809_v26, %v9806_v25  ;;  %v8736_v13 = vpack.c.bf16 %v9824_v36, %v9822_v35  ;;  %v8709_v14 = vpack.c.bf16 %v676_v33, %v669_v32  ;;  %v1569_v23 = vsel %vm583_vm1, %v578_v20, 0  ;;  %p9250_p6 = scmp.lt.s32.totalorder %s10310_s24, %s9248_s29 }
 0x101   : > { %8692 = vmatpush3.bf16.msra.mxu0 %v8691_v55  ;;  %8728 = vmatpush3.bf16.msra.mxu1 %v8727_v4  ;;  %v1184_v8 = vand.u32 4294901760, %v1183_v6  ;;  %v8745_v15 = vpack.c.bf16 %v1168_v43, %v1161_v41  ;;  %v8712_v16 = vpack.c.bf16 %v690_v45, %v683_v44  ;;  %v8748_v18 = vpack.c.bf16 %v1182_v2, %v1175_v57 }
 0x102   : > { %8693 = vmatprep.subr.bf16.mxu0 %v9392_v0  ;;  %8729 = vmatprep.subr.bf16.mxu1 %v9392_v0  ;;  %v1578_v31 = vand.u32 4294901760, %v1566_v28  ;;  %v1581_v32 = vand.u32 4294901760, %v1567_v29 }
 0x103   : > { %8145 = vmatprep.mubr.msk.f32.mxu0 %vm9393_vm0, %v9394_v1  ;;  %v8730_v9 = vpack.c.bf16 %v1184_v8, %v1177_v5  ;;  %8211 = vmatprep.mubr.msk.f32.mxu1 %vm9393_vm0, %v9394_v1 }
 0x104   : > { %v8760_v36 = vpack.c.bf16 %v1581_v32, %v1578_v31 }
 0x105   : > { %8695 = vmatpush3.bf16.msra.mxu0 %v8694_v7  ;;  %8731 = vmatpush3.bf16.msra.mxu1 %v8730_v9 }
 0x106   : > { %8696 = vmatprep.subr.bf16.mxu0 %v9392_v0  ;;  %8732 = vmatprep.subr.bf16.mxu1 %v9392_v0 }
 0x108   : > { %8146 = vmatmul.mubr.f32.vlgmr.msra.gmra.mrb[0].mxu0 %v9814_v30  ;;  %8212 = vmatmul.mubr.f32.vlgmr.msra.gmra.mrb[0].mxu1 %v9826_v37 }
 0x109   : > { %8698 = vmatpush3.bf16.msra.mxu0 %v8697_v10  ;;  %8734 = vmatpush3.bf16.msra.mxu1 %v8733_v11 }
 0x10a   : > { %8699 = vmatprep.subr.bf16.mxu0 %v9392_v0  ;;  %8735 = vmatprep.subr.bf16.mxu1 %v9392_v0 }
 0x10b   : > { %8156 = vmatprep.mubr.msk.f32.mxu0 %vm9393_vm0, %v9394_v1  ;;  %8222 = vmatprep.mubr.msk.f32.mxu1 %vm9393_vm0, %v9394_v1 }
 0x10d   : > { %8701 = vmatpush3.bf16.msra.mxu0 %v8700_v12  ;;  %8737 = vmatpush3.bf16.msra.mxu1 %v8736_v13 }
 0x10e   : > { %8702 = vmatprep.subr.bf16.mxu0 %v9392_v0  ;;  %8738 = vmatprep.subr.bf16.mxu1 %v9392_v0 }
 0x110   : > { %8157 = vmatmul.mubr.f32.vlgmr.msra.gmra.mrb[0].mxu0 %v9829_v38  ;;  %8223 = vmatmul.mubr.f32.vlgmr.msra.gmra.mrb[0].mxu1 %v9840_v42  ;;  %v1673_v38 = vsub.f32 %v1567_v29, %v1581_v32 }
 0x111   : > { %8704 = vmatpush3.bf16.msra.mxu0 %v9790_v17  ;;  %8740 = vmatpush3.bf16.msra.mxu1 %v9800_v22 }
 0x112   : > { %8705 = vmatprep.subr.bf16.mxu0 %v9392_v0  ;;  %8741 = vmatprep.subr.bf16.mxu1 %v9392_v0  ;;  %v1674_v44 = vand.u32 4294901760, %v1673_v38 }
 0x113   : > { %8167 = vmatprep.mubr.msk.f32.mxu0 %vm9393_vm0, %v9394_v1  ;;  %8233 = vmatprep.mubr.msk.f32.mxu1 %vm9393_vm0, %v9394_v1 }
 0x114   : > { %v1675_v48 = vsub.f32 %v1673_v38, %v1674_v44 }
 0x115   : > { %8707 = vmatpush3.bf16.msra.mxu0 %v9804_v24  ;;  %8743 = vmatpush3.bf16.msra.mxu1 %v9820_v34 }
 0x116   : > { %8708 = vmatprep.subr.bf16.mxu0 %v9392_v0  ;;  %8744 = vmatprep.subr.bf16.mxu1 %v9392_v0  ;;  %v1676_v51 = vand.u32 4294901760, %v1675_v48 }
 0x118   : > { %8168 = vmatmul.mubr.f32.vlgmr.msra.gmra.mrb[0].mxu0 %v658_v46  ;;  %8234 = vmatmul.mubr.f32.vlgmr.msra.gmra.mrb[0].mxu1 %v1150_v50 }
 0x119   : > { %8710 = vmatpush3.bf16.msra.mxu0 %v8709_v14  ;;  %8746 = vmatpush3.bf16.msra.mxu1 %v8745_v15 }
 0x11a   : > { %8711 = vmatprep.subr.bf16.mxu0 %v9392_v0  ;;  %8747 = vmatprep.subr.bf16.mxu1 %v9392_v0 }
 0x11b   : > { %8178 = vmatprep.mubr.msk.f32.mxu0 %vm9393_vm0, %v9394_v1  ;;  %8244 = vmatprep.mubr.msk.f32.mxu1 %vm9393_vm0, %v9394_v1 }
 0x11d   : > { %8713 = vmatpush3.bf16.msra.mxu0 %v8712_v16  ;;  %8749 = vmatpush3.bf16.msra.mxu1 %v8748_v18 }
 0x11e   : > { %8714 = vmatprep.subr.bf16.mxu0 %v9392_v0  ;;  %8750 = vmatprep.subr.bf16.mxu1 %v9392_v0 }
 0x120   : > { %8179 = vmatmul.mubr.f32.vlgmr.msra.gmra.mrb[0].mxu0 %v9814_v30  ;;  %8245 = vmatmul.mubr.f32.vlgmr.msra.gmra.mrb[0].mxu1 %v9826_v37 }
 0x121   : > { %8716 = vmatpush3.bf16.msra.mxu0 %v9790_v17  ;;  %8752 = vmatpush3.bf16.msra.mxu1 %v9800_v22  ;;  %v1564_v17 = vld [vmem:[#allocation11] sm:$0xff]  ;;  %v1575_v22 = vand.u32 4294901760, %v1565_v19 }
 0x122   : > { %8717 = vmatprep.subr.bf16.mxu0 %v9392_v0  ;;  %8753 = vmatprep.subr.bf16.mxu1 %v9392_v0  ;;  %v1572_v21 = vand.u32 4294901760, %v1564_v17 }
 0x123   : > { %8189 = vmatprep.mubr.msk.f32.mxu0 %vm9393_vm0, %v9394_v1  ;;  %8255 = vmatprep.mubr.msk.f32.mxu1 %vm9393_vm0, %v9394_v1  ;;  %v1659_v27 = vsub.f32 %v1565_v19, %v1575_v22 }
 0x124   : > { %v8757_v25 = vpack.c.bf16 %v1575_v22, %v1572_v21  ;;  %v1652_v26 = vsub.f32 %v1564_v17, %v1572_v21 }
 0x125   : > { %8719 = vmatpush3.bf16.msra.mxu0 %v9804_v24  ;;  %8755 = vmatpush3.bf16.msra.mxu1 %v9820_v34  ;;  %v9963_v24 = vand.u32 4294901760, %v1569_v23  ;;  %v1660_v34 = vand.u32 4294901760, %v1659_v27 }
 0x126   : > { %8756 = vmatprep.subr.bf16.mxu0 %v9392_v0  ;;  %8324 = vmatprep.subr.mxu1 %v9394_v1  ;;  %v1653_v33 = vand.u32 4294901760, %v1652_v26  ;;  %v8769_v53 = vpack.c.bf16 %v1659_v27, %v1652_v26 }
 0x127   : > { %v1661_v41 = vsub.f32 %v1659_v27, %v1660_v34 }
 0x128   : > { %8190 = vmatmul.mubr.f32.vlgmr.msra.gmra.mrb[0].mxu0 %v9814_v30  ;;  %8256 = vmatmul.mubr.f32.vlgmr.msra.gmra.mrb[0].mxu1 %v9826_v37  ;;  %v1641_v30 = vsub.f32 %v1569_v23, %v9963_v24  ;;  %v1666_v37 = vsub.f32 %v1566_v28, %v1578_v31  ;;  %v1654_v39 = vsub.f32 %v1652_v26, %v1653_v33 }
 0x129   : > { %8266 = vmatprep.mubr.msk.f32.mxu0 %vm9393_vm0, %v9394_v1  ;;  %8326 = vmatprep.mubr.msk.f32.mxu1 %vm9393_vm0, %v9394_v1  ;;  %v1662_v46 = vand.u32 4294901760, %v1661_v41  ;;  %v8781_v55 = vpack.c.bf16 %v1660_v34, %v1653_v33 }
 0x12a   : > { %8758 = vmatpush3.bf16.msra.mxu0 %v8757_v25  ;;  %v1642_v35 = vand.u32 4294901760, %v1641_v30  ;;  %v1655_v42 = vand.u32 4294901760, %v1654_v39  ;;  %v1667_v43 = vand.u32 4294901760, %v1666_v37  ;;  %v8772_v54 = vpack.c.bf16 %v1673_v38, %v1666_v37 }
 0x12b   : > { %8759 = vmatprep.subr.bf16.mxu0 %v9392_v0 }
 0x12c   : > { %v1643_v40 = vsub.f32 %v1641_v30, %v1642_v35  ;;  %v1668_v47 = vsub.f32 %v1666_v37, %v1667_v43  ;;  %v8763_v49 = vpack.c.bf16 %v1662_v46, %v1655_v42  ;;  %v8784_v56 = vpack.c.bf16 %v1674_v44, %v1667_v43 }
 0x12e   : > { %8761 = vmatpush3.bf16.msra.mxu0 %v8760_v36  ;;  %v1644_v45 = vand.u32 4294901760, %v1643_v40  ;;  %v1669_v50 = vand.u32 4294901760, %v1668_v47 }
 0x12f   : > { %8762 = vmatprep.subr.bf16.mxu0 %v9392_v0 }
 0x130   : > { %v8766_v52 = vpack.c.bf16 %v1676_v51, %v1669_v50 }
 0x131   : > { %8267 = vmatmul.mubr.f32.vlgmr.msra.gmra.mrb[2].mxu0 %v1644_v45 }
 0x132   : > { %8277 = vmatprep.mubr.msk.f32.mxu0 %vm9393_vm0, %v9394_v1  ;;  %8764 = vmatpush3.bf16.msra.mxu0 %v8763_v49 }
 0x133   : > { %8765 = vmatprep.subr.bf16.mxu0 %v9392_v0 }
 0x136   : > { %8767 = vmatpush3.bf16.msra.mxu0 %v8766_v52 }
 0x137   : > { %8768 = vmatprep.subr.bf16.mxu0 %v9392_v0 }
 0x139   : > { %8278 = vmatmul.mubr.f32.vlgmr.msra.gmra.mrb[2].mxu0 %v9963_v24 }
 0x13a   : > { %8770 = vmatpush3.bf16.msra.mxu0 %v8769_v53  ;;  %8288 = vmatprep.mubr.msk.f32.mxu0 %vm9393_vm0, %v9394_v1 }
 0x13b   : > { %8771 = vmatprep.subr.bf16.mxu0 %v9392_v0 }
 0x13e   : > { %8773 = vmatpush3.bf16.msra.mxu0 %v8772_v54 }
 0x13f   : > { %8774 = vmatprep.subr.bf16.mxu0 %v9392_v0 }
 0x141   : > { %8289 = vmatmul.mubr.f32.vlgmr.msra.gmra.mrb[2].mxu0 %v1641_v30 }
 0x142   : > { %8776 = vmatpush3.bf16.msra.mxu0 %v8757_v25  ;;  %8299 = vmatprep.mubr.msk.f32.mxu0 %vm9393_vm0, %v9394_v1 }
 0x143   : > { %8777 = vmatprep.subr.bf16.mxu0 %v9392_v0 }
 0x146   : > { %8779 = vmatpush3.bf16.msra.mxu0 %v8760_v36 }
 0x147   : > { %8780 = vmatprep.subr.bf16.mxu0 %v9392_v0 }
 0x149   : > { %8300 = vmatmul.mubr.f32.vlgmr.msra.gmra.mrb[2].mxu0 %v1642_v35 }
 0x14a   : > { %8782 = vmatpush3.bf16.msra.mxu0 %v8781_v55  ;;  %8310 = vmatprep.mubr.msk.f32.mxu0 %vm9393_vm0, %v9394_v1 }
 0x14b   : > { %8783 = vmatprep.subr.bf16.mxu0 %v9392_v0 }
 0x14e   : > { %8785 = vmatpush3.bf16.msra.mxu0 %v8784_v56 }
 0x14f   : > { %8786 = vmatprep.subr.bf16.mxu0 %v9392_v0 }
 0x151   : > { %8311 = vmatmul.mubr.f32.vlgmr.msra.gmra.mrb[2].mxu0 %v9963_v24 }
 0x152   : > { %8788 = vmatpush3.bf16.msra.mxu0 %v8757_v25  ;;  %8321 = vmatprep.mubr.msk.f32.mxu0 %vm9393_vm0, %v9394_v1 }
 0x153   : > { %8789 = vmatprep.subr.bf16.mxu0 %v9392_v0 }
 0x156   : > { %8791 = vmatpush3.bf16.msra.mxu0 %v8760_v36 }
 0x157   : > { %8384 = vmatprep.subr.mxu0 %v9394_v1 }
 0x159   : > { %8322 = vmatmul.mubr.f32.vlgmr.msra.gmra.mrb[2].mxu0 %v9963_v24 }
 0x15a   : > { %8386 = vmatprep.mubr.msk.f32.mxu0 %vm9393_vm0, %v9394_v1 }
 0x1fb   : > { %v9993_v57 = vpop.f32.mrb[0].mxu0  ;;  %v9997_v59 = vpop.f32.mrb[0].mxu1 }
 0x1fc   : > { %v2062_v58 = vsel %vm2060_vm2, %v9993_v57, 0  ;;  %2975 = vrot.lane.b32.xlu0 %v9993_v57, %s9395_s25  ;;  %v8191_v0 = vpop.f32.mrb[1].mxu0  ;;  %v2065_v61 = vsel %vm2060_vm2, %v9997_v59, 0  ;;  %v8257_v62 = vpop.f32.mrb[1].mxu1 }
 0x1fd   : > { %v2133_v60 = vand.u32 4294901760, %v2062_v58  ;;  %v2068_v63 = vand.u32 4294901760, %v2065_v61 }
 0x1ff   : > { %v2134_v2 = vsub.f32 %v2062_v58, %v2133_v60  ;;  %v2145_v3 = vsub.f32 %v2065_v61, %v2068_v63  ;;  %8325 = vmatpush3.xpose.msra.mxu1 %v2068_v63 }
 0x200   : > { %2977 = vrot.lane.b32.xlu0 %v9997_v59, %s9395_s25  ;;  %8329 = vmatprep.subr.mxu1 %v9394_v1 }
 0x201   : > { %v2135_v4 = vand.u32 4294901760, %v2134_v2  ;;  %v2146_v5 = vand.u32 4294901760, %v2145_v3 }
 0x203   : > { %v2136_v6 = vsub.f32 %v2134_v2, %v2135_v4  ;;  %v2147_v7 = vsub.f32 %v2145_v3, %v2146_v5 }
 0x205   : > { %v2137_v8 = vand.u32 4294901760, %v2136_v6  ;;  %v2148_v9 = vand.u32 4294901760, %v2147_v7 }
 0x207   : > { %8327 = vmatmul.mubr.f32.vlgmr.msra.gmra.mrb[2].mxu1 %v2137_v8 }
 0x208   : > { %8330 = vmatpush3.xpose.msra.mxu1 %v2148_v9  ;;  %8331 = vmatprep.mubr.msk.f32.mxu1 %vm9393_vm0, %v9394_v1 }
 0x209   : > { %8334 = vmatprep.subr.mxu1 %v9394_v1 }
 0x20f   : > { %8332 = vmatmul.mubr.f32.vlgmr.msra.gmra.mrb[2].mxu1 %v2133_v60 }
 0x210   : > { %8335 = vmatpush3.xpose.msra.mxu1 %v2145_v3  ;;  %8336 = vmatprep.mubr.msk.f32.mxu1 %vm9393_vm0, %v9394_v1 }
 0x211   : > { %8339 = vmatprep.subr.mxu1 %v9394_v1 }
 0x217   : > { %8337 = vmatmul.mubr.f32.vlgmr.msra.gmra.mrb[2].mxu1 %v2134_v2 }
 0x218   : > { %8340 = vmatpush3.xpose.msra.mxu1 %v2068_v63  ;;  %8341 = vmatprep.mubr.msk.f32.mxu1 %vm9393_vm0, %v9394_v1 }
 0x219   : > { %8344 = vmatprep.subr.mxu1 %v9394_v1 }
 0x21f   : > { %8342 = vmatmul.mubr.f32.vlgmr.msra.gmra.mrb[2].mxu1 %v2135_v4 }
 0x220   : > { %8345 = vmatpush3.xpose.msra.mxu1 %v2146_v5  ;;  %8346 = vmatprep.mubr.msk.f32.mxu1 %vm9393_vm0, %v9394_v1 }
 0x221   : > { %8349 = vmatprep.subr.mxu1 %v9394_v1 }
 0x227   : > { %8347 = vmatmul.mubr.f32.vlgmr.msra.gmra.mrb[2].mxu1 %v2133_v60 }
 0x228   : > { %8350 = vmatpush3.xpose.msra.mxu1 %v2068_v63  ;;  %8351 = vmatprep.mubr.msk.f32.mxu1 %vm9393_vm0, %v9394_v1 }
 0x229   : > { %8354 = vmatprep.subr.mxu1 %v9394_v1 }
 0x22c   : > { %v10040_v24 = vpop.f32.mrb[2].mxu0 }
 0x22d   : > { %v8323_v25 = vpop.f32.mrb[3].mxu0  ;;  %v10043_v26 = vand.u32 4294901760, %v10040_v24 }
 0x22f   : > { %8352 = vmatmul.mubr.f32.vlgmr.msra.gmra.mrb[2].mxu1 %v2133_v60  ;;  %v2606_v46 = vsub.f32 %v10040_v24, %v10043_v26 }
 0x230   : > { %8356 = vmatprep.mubr.msk.f32.mxu1 %vm9393_vm0, %v9394_v1  ;;  %8355 = vmatpush3.msra.mxu1 %v10043_v26 }
 0x231   : > { %8359 = vmatprep.subr.mxu1 %v9394_v1  ;;  %v2607_v49 = vand.u32 4294901760, %v2606_v46 }
 0x233   : > { %v2608_v52 = vsub.f32 %v2606_v46, %v2607_v49 }
 0x235   : > { %v2609_v55 = vand.u32 4294901760, %v2608_v52 }
 0x26e   : > { %v2976_v10 = vpop.permute.xlu0 %2975 }
 0x26f   : > { %v2979_v11 = vsel %vm2060_vm2, %v2976_v10, 0  ;;  %v2057_v10 = vld [vmem:[#allocation13 + $0x8] sm:$0xff] }
 0x270   : > { %v3049_v12 = vand.u32 4294901760, %v2979_v11 }
 0x272   : > { %v3050_v13 = vsub.f32 %v2979_v11, %v3049_v12  ;;  %v2978_v14 = vpop.permute.xlu0 %2977  ;;  %v3901_v11 = vand.u32 4294901760, %v2057_v10 }
 0x273   : > { %v2981_v15 = vsel %vm2060_vm2, %v2978_v14, 0 }
 0x274   : > { %v3051_v16 = vand.u32 4294901760, %v3050_v13  ;;  %v2984_v18 = vand.u32 4294901760, %v2981_v15 }
 0x276   : > { %v3052_v17 = vsub.f32 %v3050_v13, %v3051_v16  ;;  %v3061_v19 = vsub.f32 %v2981_v15, %v2984_v18  ;;  %8385 = vmatpush3.xpose.msra.mxu0 %v2984_v18 }
 0x277   : > { %8389 = vmatprep.subr.mxu0 %v9394_v1 }
 0x278   : > { %v3053_v20 = vand.u32 4294901760, %v3052_v17  ;;  %v3062_v21 = vand.u32 4294901760, %v3061_v19  ;;  %v2056_v17 = vld [vmem:[#allocation13] sm:$0xff] }
 0x27a   : > { %v3063_v22 = vsub.f32 %v3061_v19, %v3062_v21  ;;  %8387 = vmatmul.mubr.f32.vlgmr.msra.gmra.mrb[4].mxu0 %v3053_v20 }
 0x27b   : > { %8391 = vmatprep.mubr.msk.f32.mxu0 %vm9393_vm0, %v9394_v1 }
 0x27c   : > { %v3064_v23 = vand.u32 4294901760, %v3063_v22 }
 0x27e   : > { %8390 = vmatpush3.xpose.msra.mxu0 %v3064_v23 }
 0x27f   : > { %8394 = vmatprep.subr.mxu0 %v9394_v1 }
 0x282   : > { %8392 = vmatmul.mubr.f32.vlgmr.msra.gmra.mrb[4].mxu0 %v3049_v12 }
 0x283   : > { %8395 = vmatpush3.xpose.msra.mxu0 %v3061_v19  ;;  %8396 = vmatprep.mubr.msk.f32.mxu0 %vm9393_vm0, %v9394_v1  ;;  %v4350_v19 = vand.u32 4294901760, %v2056_v17 }
 0x284   : > { %8399 = vmatprep.subr.mxu0 %v9394_v1 }
 0x285   : > { %v10118_v20 = vsub.f32 %v2056_v17, %v4350_v19 }
 0x28a   : > { %8397 = vmatmul.mubr.f32.vlgmr.msra.gmra.mrb[4].mxu0 %v3050_v13 }
 0x28b   : > { %8400 = vmatpush3.xpose.msra.mxu0 %v2984_v18  ;;  %8401 = vmatprep.mubr.msk.f32.mxu0 %vm9393_vm0, %v9394_v1 }
 0x28c   : > { %8404 = vmatprep.subr.mxu0 %v9394_v1 }
 0x292   : > { %8402 = vmatmul.mubr.f32.vlgmr.msra.gmra.mrb[4].mxu0 %v3051_v16 }
 0x293   : > { %8405 = vmatpush3.xpose.msra.mxu0 %v3062_v21  ;;  %8406 = vmatprep.mubr.msk.f32.mxu0 %vm9393_vm0, %v9394_v1 }
 0x294   : > { %8409 = vmatprep.subr.mxu0 %v9394_v1 }
 0x29a   : > { %8407 = vmatmul.mubr.f32.vlgmr.msra.gmra.mrb[4].mxu0 %v3049_v12 }
 0x29b   : > { %8410 = vmatpush3.xpose.msra.mxu0 %v2984_v18  ;;  %8411 = vmatprep.mubr.msk.f32.mxu0 %vm9393_vm0, %v9394_v1 }
 0x29c   : > { %8444 = vmatprep.subr.mxu0 %v9394_v1 }
 0x2a2   : > { %8412 = vmatmul.mubr.f32.vlgmr.msra.gmra.mrb[4].mxu0 %v3049_v12  ;;  %v3978_v12 = vsub.f32 %v2057_v10, %v3901_v11 }
 0x2a3   : > { %8446 = vmatprep.mubr.msk.f32.mxu0 %vm9393_vm0, %v9394_v1  ;;  %8445 = vmatpush3.msra.mxu0 %v3901_v11 }
 0x2a4   : > { %8454 = vmatprep.subr.mxu0 %v9394_v1  ;;  %v3979_v13 = vand.u32 4294901760, %v3978_v12 }
 0x2a6   : > { %v3980_v14 = vsub.f32 %v3978_v12, %v3979_v13 }
 0x2a8   : > { %v3981_v15 = vand.u32 4294901760, %v3980_v14 }
 0x302   : > { %v2509_v27 = vpop.f32.mrb[2].mxu1 }
 0x303   : > { %v8353_v28 = vpop.f32.mrb[3].mxu1  ;;  %v2513_v29 = vsel %vm2060_vm2, %v2509_v27, -inf }
 0x304   : > { %2514 = vmax.xlane.f32.xlu1 %v2513_v29 }
 0x375   : > { %v3425_v30 = vpop.f32.mrb[4].mxu0 }
 0x376   : > { %v8413_v31 = vpop.f32.mrb[5].mxu0  ;;  %v3429_v32 = vsel %vm2060_vm2, %v3425_v30, -inf }
 0x377   : > { %3430 = vmax.xlane.f32.xlu1 %v3429_v32 }
 0x391   : > { %v2515_v33 = vpop.xlane.xlu1 %2514 }
 0x392   : > { %v2516_v34 = vsub.f32 %v2509_v27, %v2515_v33 }
 0x394   : > { %v2517_v35 = vmul.f32 1.442695, %v2516_v34 }
 0x396   : > { %9020 = vpow2.f32 %v2517_v35 }
 0x3a0   : > { %v9021_v36 = vpop.eup %9020 }
 0x3a1   : > { %v2519_v37 = vsel %vm2060_vm2, %v9021_v36, 0.0 }
 0x3a2   : > { %2520 = vadd.xlane.f32.xlu0 %v2519_v37 }
 0x404   : > { %v3431_v38 = vpop.xlane.xlu1 %3430 }
 0x405   : > { %v3432_v39 = vsub.f32 %v3425_v30, %v3431_v38 }
 0x407   : > { %v3433_v40 = vmul.f32 1.442695, %v3432_v39 }
 0x409   : > { %9022 = vpow2.f32 %v3433_v40 }
 0x413   : > { %v9023_v41 = vpop.eup %9022 }
 0x414   : > { %v3435_v42 = vsel %vm2060_vm2, %v9023_v41, 0.0 }
 0x415   : > { %3436 = vadd.xlane.f32.xlu1 %v3435_v42 }
 0x426   : > { %3443 = vrot.lane.b32.xlu1 %v10040_v24, %s9395_s25  ;;  %s9249_s25 = scalar_lea.vmem %s9248_s29, 1024 }
 0x427   : > { %p9251_p5 = scmp.lt.s32.totalorder %s9249_s25, %s9243_s16 }
 0x429   : > { %p9252_p2 = por %p9251_p5, %p9250_p6 }
 0x42a   : > { %4795 = vrot.lane.b32.xlu1 %v9993_v57, %s9396_s13 }
 0x42b   : > { %p9253_p4 = pnand %p9252_p2, %p9246_p1 }
 0x42e   : > { %4797 = vrot.lane.b32.xlu1 %v9997_v59, %s9396_s13 }
 0x42f   : > { %v2521_v43 = vpop.xlane.xlu0 %2520 }
 0x430   : > { %9024 = vrcp.f32 %v2521_v43 }
 0x43a   : > { %v9025_v44 = vpop.eup %9024 }
 0x43b   : > { %v2523_v45 = vmul.f32 %v9025_v44, %v9021_v36 }
 0x43d   : > { %v2526_v47 = vsel %vm2060_vm2, %v2523_v45, 0  ;;  %2524 = vst.msk [vmem:[%s10066_s18] sm:$0xff] %vm2060_vm2, %v2523_v45 }
 0x43e   : > { %v2594_v48 = vand.u32 4294901760, %v2526_v47 }
 0x440   : > { %v2595_v50 = vsub.f32 %v2526_v47, %v2594_v48 }
 0x442   : > { %v2596_v51 = vand.u32 4294901760, %v2595_v50 }
 0x444   : > { %v2597_v53 = vsub.f32 %v2595_v50, %v2596_v51 }
 0x446   : > { %v2598_v54 = vand.u32 4294901760, %v2597_v53 }
 0x448   : > { %8357 = vmatmul.mubr.f32.vlgmr.msra.gmra.mrb[4].mxu1 %v2598_v54 }
 0x449   : > { %8360 = vmatpush3.msra.mxu1 %v2609_v55  ;;  %8361 = vmatprep.mubr.msk.f32.mxu1 %vm9393_vm0, %v9394_v1 }
 0x44a   : > { %8364 = vmatprep.subr.mxu1 %v9394_v1 }
 0x450   : > { %8362 = vmatmul.mubr.f32.vlgmr.msra.gmra.mrb[4].mxu1 %v2594_v48 }
 0x451   : > { %8365 = vmatpush3.msra.mxu1 %v2606_v46  ;;  %8366 = vmatprep.mubr.msk.f32.mxu1 %vm9393_vm0, %v9394_v1 }
 0x452   : > { %8369 = vmatprep.subr.mxu1 %v9394_v1 }
 0x458   : > { %8367 = vmatmul.mubr.f32.vlgmr.msra.gmra.mrb[4].mxu1 %v2595_v50 }
 0x459   : > { %8370 = vmatpush3.msra.mxu1 %v10043_v26  ;;  %8371 = vmatprep.mubr.msk.f32.mxu1 %vm9393_vm0, %v9394_v1 }
 0x45a   : > { %8374 = vmatprep.subr.mxu1 %v9394_v1 }
 0x460   : > { %8372 = vmatmul.mubr.f32.vlgmr.msra.gmra.mrb[4].mxu1 %v2596_v51 }
 0x461   : > { %8375 = vmatpush3.msra.mxu1 %v2607_v49  ;;  %8376 = vmatprep.mubr.msk.f32.mxu1 %vm9393_vm0, %v9394_v1 }
 0x462   : > { %8379 = vmatprep.subr.mxu1 %v9394_v1 }
 0x468   : > { %8377 = vmatmul.mubr.f32.vlgmr.msra.gmra.mrb[4].mxu1 %v2594_v48 }
 0x469   : > { %8380 = vmatpush3.msra.mxu1 %v10043_v26  ;;  %8381 = vmatprep.mubr.msk.f32.mxu1 %vm9393_vm0, %v9394_v1  ;;  %v4428_v26 = vand.u32 4294901760, %v10118_v20 }
 0x46a   : > { %8414 = vmatprep.subr.mxu1 %v9394_v1 }
 0x46b   : > { %v4429_v31 = vsub.f32 %v10118_v20, %v4428_v26 }
 0x46d   : > { %v4430_v36 = vand.u32 4294901760, %v4429_v31 }
 0x470   : > { %8382 = vmatmul.mubr.f32.vlgmr.msra.gmra.mrb[4].mxu1 %v2594_v48 }
 0x471   : > { %8416 = vmatprep.mubr.msk.f32.mxu1 %vm9393_vm0, %v9394_v1 }
 0x4a2   : > { %v3437_v56 = vpop.xlane.xlu1 %3436 }
 0x4a3   : > { %9026 = vrcp.f32 %v3437_v56 }
 0x4a6   : > { %v3444_v58 = vpop.permute.xlu1 %3443 }
 0x4a7   : > { %v3450_v0 = vand.u32 4294901760, %v3444_v58 }
 0x4a9   : > { %8415 = vmatpush3.msra.mxu1 %v3450_v0  ;;  %v3527_v62 = vsub.f32 %v3444_v58, %v3450_v0 }
 0x4aa   : > { %8419 = vmatprep.subr.mxu1 %v9394_v1  ;;  %v4796_v33 = vpop.permute.xlu1 %4795 }
 0x4ab   : > { %v3528_v3 = vand.u32 4294901760, %v3527_v62  ;;  %v4799_v39 = vsel %vm2060_vm2, %v4796_v33, 0 }
 0x4ac   : > { %v4869_v42 = vand.u32 4294901760, %v4799_v39 }
 0x4ad   : > { %v9027_v60 = vpop.eup %9026  ;;  %v3529_v6 = vsub.f32 %v3527_v62, %v3528_v3 }
 0x4ae   : > { %v3439_v61 = vmul.f32 %v9027_v60, %v9023_v41  ;;  %v4798_v38 = vpop.permute.xlu1 %4797  ;;  %v4870_v45 = vsub.f32 %v4799_v39, %v4869_v42 }
 0x4af   : > { %v3530_v9 = vand.u32 4294901760, %v3529_v6  ;;  %v4801_v41 = vsel %vm2060_vm2, %v4798_v38, 0 }
 0x4b0   : > { %v3447_v63 = vsel %vm2060_vm2, %v3439_v61, 0  ;;  %7875 = vst.msk [vmem:[%s10066_s18 + $0x8] sm:$0xff] %vm2060_vm2, %v3439_v61  ;;  %v4804_v43 = vand.u32 4294901760, %v4801_v41  ;;  %v4871_v47 = vand.u32 4294901760, %v4870_v45 }
 0x4b1   : > { %v3515_v2 = vand.u32 4294901760, %v3447_v63 }
 0x4b2   : > { %v4881_v46 = vsub.f32 %v4801_v41, %v4804_v43  ;;  %v4872_v49 = vsub.f32 %v4870_v45, %v4871_v47 }
 0x4b3   : > { %v3516_v4 = vsub.f32 %v3447_v63, %v3515_v2 }
 0x4b4   : > { %v4882_v48 = vand.u32 4294901760, %v4881_v46  ;;  %v4873_v51 = vand.u32 4294901760, %v4872_v49  ;;  %v2058_v49 = vld [vmem:[#allocation13 + $0x10] sm:$0xff] }
 0x4b5   : > { %v3517_v5 = vand.u32 4294901760, %v3516_v4 }
 0x4b6   : > { %v4883_v50 = vsub.f32 %v4881_v46, %v4882_v48 }
 0x4b7   : > { %v3518_v7 = vsub.f32 %v3516_v4, %v3517_v5 }
 0x4b8   : > { %v4884_v52 = vand.u32 4294901760, %v4883_v50  ;;  %v5720_v50 = vand.u32 4294901760, %v2058_v49 }
 0x4b9   : > { %v3519_v8 = vand.u32 4294901760, %v3518_v7 }
 0x4bb   : > { %8417 = vmatmul.mubr.f32.vlgmr.msra.gmra.mrb[6].mxu1 %v3519_v8 }
 0x4bc   : > { %8420 = vmatpush3.msra.mxu1 %v3530_v9  ;;  %8421 = vmatprep.mubr.msk.f32.mxu1 %vm9393_vm0, %v9394_v1 }
 0x4bd   : > { %8424 = vmatprep.subr.mxu1 %v9394_v1 }
 0x4c3   : > { %8422 = vmatmul.mubr.f32.vlgmr.msra.gmra.mrb[6].mxu1 %v3515_v2 }
 0x4c4   : > { %8425 = vmatpush3.msra.mxu1 %v3527_v62  ;;  %8426 = vmatprep.mubr.msk.f32.mxu1 %vm9393_vm0, %v9394_v1 }
 0x4c5   : > { %8429 = vmatprep.subr.mxu1 %v9394_v1 }
 0x4cb   : > { %8427 = vmatmul.mubr.f32.vlgmr.msra.gmra.mrb[6].mxu1 %v3516_v4 }
 0x4cc   : > { %8430 = vmatpush3.msra.mxu1 %v3450_v0  ;;  %8431 = vmatprep.mubr.msk.f32.mxu1 %vm9393_vm0, %v9394_v1 }
 0x4cd   : > { %8434 = vmatprep.subr.mxu1 %v9394_v1 }
 0x4d3   : > { %8432 = vmatmul.mubr.f32.vlgmr.msra.gmra.mrb[6].mxu1 %v3517_v5 }
 0x4d4   : > { %8435 = vmatpush3.msra.mxu1 %v3528_v3  ;;  %8436 = vmatprep.mubr.msk.f32.mxu1 %vm9393_vm0, %v9394_v1 }
 0x4d5   : > { %8439 = vmatprep.subr.mxu1 %v9394_v1 }
 0x4db   : > { %8437 = vmatmul.mubr.f32.vlgmr.msra.gmra.mrb[6].mxu1 %v3515_v2 }
 0x4dc   : > { %8440 = vmatpush3.msra.mxu1 %v3450_v0  ;;  %8441 = vmatprep.mubr.msk.f32.mxu1 %vm9393_vm0, %v9394_v1 }
 0x4dd   : > { %8449 = vmatprep.subr.mxu1 %v9394_v1 }
 0x4e3   : > { %8442 = vmatmul.mubr.f32.vlgmr.msra.gmra.mrb[6].mxu1 %v3515_v2 }
 0x4e4   : > { %8451 = vmatprep.mubr.msk.f32.mxu1 %vm9393_vm0, %v9394_v1  ;;  %8450 = vmatpush3.msra.mxu1 %v3981_v15 }
 0x4e5   : > { %8459 = vmatprep.subr.mxu1 %v9394_v1 }
 0x543   : > { %v2970_v16 = vpop.f32.mrb[4].mxu1 }
 0x544   : > { %2974 = vst.msk [vmem:[%s10114_s1] sm:$0xff] %vm2060_vm2, %v2970_v16  ;;  %v8383_v18 = vpop.f32.mrb[5].mxu1  ;;  %v4347_v27 = vsel %vm2060_vm2, %v2970_v16, 0 }
 0x545   : > { %v4415_v29 = vand.u32 4294901760, %v4347_v27 }
 0x547   : > { %v4416_v34 = vsub.f32 %v4347_v27, %v4415_v29 }
 0x549   : > { %v4417_v37 = vand.u32 4294901760, %v4416_v34 }
 0x54b   : > { %v4418_v40 = vsub.f32 %v4416_v34, %v4417_v37 }
 0x54d   : > { %v4419_v44 = vand.u32 4294901760, %v4418_v40 }
 0x5b6   : > { %v3891_v21 = vpop.f32.mrb[6].mxu1 }
 0x5b7   : > { %7876 = vst.msk [vmem:[%s10114_s1 + $0x8] sm:$0xff] %vm2060_vm2, %v3891_v21  ;;  %v3898_v22 = vsel %vm2060_vm2, %v3891_v21, 0  ;;  %v8443_v23 = vpop.f32.mrb[7].mxu1 }
 0x5b8   : > { %v3966_v25 = vand.u32 4294901760, %v3898_v22 }
 0x5ba   : > { %v3967_v28 = vsub.f32 %v3898_v22, %v3966_v25  ;;  %8452 = vmatmul.mubr.f32.vlgmr.msra.gmra.mrb[8].mxu1 %v3966_v25 }
 0x5bb   : > { %8460 = vmatpush3.msra.mxu1 %v3901_v11  ;;  %8461 = vmatprep.mubr.msk.f32.mxu1 %vm9393_vm0, %v9394_v1 }
 0x5bc   : > { %v3968_v30 = vand.u32 4294901760, %v3967_v28  ;;  %8469 = vmatprep.subr.mxu1 %v9394_v1 }
 0x5be   : > { %v3969_v32 = vsub.f32 %v3967_v28, %v3968_v30  ;;  %8462 = vmatmul.mubr.f32.vlgmr.msra.gmra.mrb[10].mxu1 %v3968_v30 }
 0x5bf   : > { %8470 = vmatpush3.msra.mxu1 %v3901_v11  ;;  %8471 = vmatprep.mubr.msk.f32.mxu1 %vm9393_vm0, %v9394_v1 }
 0x5c0   : > { %v3970_v35 = vand.u32 4294901760, %v3969_v32  ;;  %8479 = vmatprep.subr.mxu1 %v9394_v1 }
 0x5c2   : > { %8447 = vmatmul.mubr.f32.vlgmr.msra.gmra.mrb[6].mxu0 %v3970_v35  ;;  %8472 = vmatmul.mubr.f32.vlgmr.msra.gmra.mrb[12].mxu1 %v3966_v25 }
 0x5c3   : > { %8455 = vmatpush3.msra.mxu0 %v3978_v12  ;;  %8456 = vmatprep.mubr.msk.f32.mxu0 %vm9393_vm0, %v9394_v1 }
 0x5c4   : > { %8480 = vmatpush3.msra.mxu1 %v4430_v36  ;;  %8481 = vmatprep.mubr.msk.f32.mxu1 %vm9393_vm0, %v9394_v1 }
 0x5c5   : > { %8464 = vmatprep.subr.mxu0 %v9394_v1  ;;  %8489 = vmatprep.subr.mxu1 %v9394_v1 }
 0x5c6   : > { %8457 = vmatmul.mubr.f32.vlgmr.msra.gmra.mrb[8].mxu0 %v3967_v28  ;;  %8482 = vmatmul.mubr.f32.vlgmr.msra.gmra.mrb[14].mxu1 %v4415_v29 }
 0x5c7   : > { %8465 = vmatpush3.msra.mxu0 %v3979_v13  ;;  %8466 = vmatprep.mubr.msk.f32.mxu0 %vm9393_vm0, %v9394_v1 }
 0x5c8   : > { %8490 = vmatpush3.msra.mxu1 %v4350_v19  ;;  %8491 = vmatprep.mubr.msk.f32.mxu1 %vm9393_vm0, %v9394_v1 }
 0x5c9   : > { %8474 = vmatprep.subr.mxu0 %v9394_v1  ;;  %8499 = vmatprep.subr.mxu1 %v9394_v1 }
 0x5ca   : > { %8467 = vmatmul.mubr.f32.vlgmr.msra.gmra.mrb[10].mxu0 %v3966_v25  ;;  %8492 = vmatmul.mubr.f32.vlgmr.msra.gmra.mrb[16].mxu1 %v4417_v37 }
 0x5cb   : > { %8475 = vmatpush3.msra.mxu0 %v4350_v19  ;;  %8476 = vmatprep.mubr.msk.f32.mxu0 %vm9393_vm0, %v9394_v1 }
 0x5cc   : > { %8500 = vmatpush3.msra.mxu1 %v4350_v19  ;;  %8501 = vmatprep.mubr.msk.f32.mxu1 %vm9393_vm0, %v9394_v1 }
 0x5cd   : > { %8484 = vmatprep.subr.mxu0 %v9394_v1  ;;  %8534 = vmatprep.subr.mxu1 %v9394_v1 }
 0x5ce   : > { %8477 = vmatmul.mubr.f32.vlgmr.msra.gmra.mrb[12].mxu0 %v4419_v44  ;;  %8502 = vmatmul.mubr.f32.vlgmr.msra.gmra.mrb[18].mxu1 %v4415_v29 }
 0x5cf   : > { %8485 = vmatpush3.msra.mxu0 %v10118_v20  ;;  %8486 = vmatprep.mubr.msk.f32.mxu0 %vm9393_vm0, %v9394_v1 }
 0x5d0   : > { %8494 = vmatprep.subr.mxu0 %v9394_v1  ;;  %8536 = vmatprep.mubr.msk.f32.mxu1 %vm9393_vm0, %v9394_v1 }
 0x5d2   : > { %8487 = vmatmul.mubr.f32.vlgmr.msra.gmra.mrb[14].mxu0 %v4416_v34 }
 0x5d3   : > { %8495 = vmatpush3.msra.mxu0 %v4428_v26  ;;  %8496 = vmatprep.mubr.msk.f32.mxu0 %vm9393_vm0, %v9394_v1 }
 0x5d4   : > { %8504 = vmatprep.subr.mxu0 %v9394_v1 }
 0x5d6   : > { %8497 = vmatmul.mubr.f32.vlgmr.msra.gmra.mrb[16].mxu0 %v4415_v29 }
 0x5d7   : > { %8506 = vmatprep.mubr.msk.f32.mxu0 %vm9393_vm0, %v9394_v1 }
 0x5da   : > { %8505 = vmatpush3.xpose.msra.mxu0 %v4804_v43 }
 0x5db   : > { %8509 = vmatprep.subr.mxu0 %v9394_v1 }
 0x5dd   : > { %8507 = vmatmul.mubr.f32.vlgmr.msra.gmra.mrb[18].mxu0 %v4873_v51  ;;  %v5797_v51 = vsub.f32 %v2058_v49, %v5720_v50 }
 0x5de   : > { %8510 = vmatpush3.xpose.msra.mxu0 %v4884_v52  ;;  %8511 = vmatprep.mubr.msk.f32.mxu0 %vm9393_vm0, %v9394_v1 }
 0x5df   : > { %8514 = vmatprep.subr.mxu0 %v9394_v1  ;;  %v5798_v52 = vand.u32 4294901760, %v5797_v51 }
 0x5e5   : > { %8512 = vmatmul.mubr.f32.vlgmr.msra.gmra.mrb[18].mxu0 %v4869_v42 }
 0x5e6   : > { %8515 = vmatpush3.xpose.msra.mxu0 %v4881_v46  ;;  %8516 = vmatprep.mubr.msk.f32.mxu0 %vm9393_vm0, %v9394_v1 }
 0x5e7   : > { %8519 = vmatprep.subr.mxu0 %v9394_v1 }
 0x5ed   : > { %8517 = vmatmul.mubr.f32.vlgmr.msra.gmra.mrb[18].mxu0 %v4870_v45 }
 0x5ee   : > { %8520 = vmatpush3.xpose.msra.mxu0 %v4804_v43  ;;  %8521 = vmatprep.mubr.msk.f32.mxu0 %vm9393_vm0, %v9394_v1 }
 0x5ef   : > { %8524 = vmatprep.subr.mxu0 %v9394_v1 }
 0x5f5   : > { %8522 = vmatmul.mubr.f32.vlgmr.msra.gmra.mrb[18].mxu0 %v4871_v47 }
 0x5f6   : > { %8525 = vmatpush3.xpose.msra.mxu0 %v4882_v48  ;;  %8526 = vmatprep.mubr.msk.f32.mxu0 %vm9393_vm0, %v9394_v1 }
 0x5f7   : > { %8529 = vmatprep.subr.mxu0 %v9394_v1 }
 0x5fd   : > { %8527 = vmatmul.mubr.f32.vlgmr.msra.gmra.mrb[18].mxu0 %v4869_v42 }
 0x5fe   : > { %8530 = vmatpush3.xpose.msra.mxu0 %v4804_v43  ;;  %8531 = vmatprep.mubr.msk.f32.mxu0 %vm9393_vm0, %v9394_v1 }
 0x5ff   : > { %8564 = vmatprep.subr.mxu0 %v9394_v1 }
 0x605   : > { %8532 = vmatmul.mubr.f32.vlgmr.msra.gmra.mrb[18].mxu0 %v4869_v42 }
 0x606   : > { %8566 = vmatprep.mubr.msk.f32.mxu0 %vm9393_vm0, %v9394_v1  ;;  %8565 = vmatpush3.msra.mxu0 %v5720_v50 }
 0x607   : > { %8574 = vmatprep.subr.mxu0 %v9394_v1 }
 0x68d   : > { %v4048_v53 = vpop.f32.mrb[8].mxu1 }
 0x68e   : > { %v8453_v54 = vpop.f32.mrb[9].mxu1 }
 0x691   : > { %v4196_v55 = vpop.f32.mrb[10].mxu1 }
 0x692   : > { %v8463_v56 = vpop.f32.mrb[11].mxu1 }
 0x695   : > { %v3972_v58 = vpop.f32.mrb[6].mxu0  ;;  %v4342_v0 = vpop.f32.mrb[12].mxu1 }
 0x696   : > { %v4049_v60 = vadd.f32 %v4048_v53, %v3972_v58  ;;  %v8448_v61 = vpop.f32.mrb[7].mxu0  ;;  %v8473_v62 = vpop.f32.mrb[13].mxu1  ;;  %v5799_v53 = vsub.f32 %v5797_v51, %v5798_v52 }
 0x698   : > { %v5800_v54 = vand.u32 4294901760, %v5799_v53 }
 0x699   : > { %v4122_v63 = vpop.f32.mrb[8].mxu0  ;;  %v4497_v2 = vpop.f32.mrb[14].mxu1 }
 0x69a   : > { %v4123_v3 = vadd.f32 %v4122_v63, %v4049_v60  ;;  %v8458_v4 = vpop.f32.mrb[9].mxu0  ;;  %v8483_v5 = vpop.f32.mrb[15].mxu1 }
 0x69c   : > { %v4197_v6 = vadd.f32 %v4196_v55, %v4123_v3 }
 0x69d   : > { %v4270_v7 = vpop.f32.mrb[10].mxu0  ;;  %v4645_v8 = vpop.f32.mrb[16].mxu1 }
 0x69e   : > { %v4271_v9 = vadd.f32 %v4270_v7, %v4197_v6  ;;  %v8468_v10 = vpop.f32.mrb[11].mxu0  ;;  %v8493_v11 = vpop.f32.mrb[17].mxu1 }
 0x6a0   : > { %v4343_v12 = vadd.f32 %v4342_v0, %v4271_v9 }
 0x6a1   : > { %v4421_v13 = vpop.f32.mrb[12].mxu0  ;;  %v4791_v14 = vpop.f32.mrb[18].mxu1 }
 0x6a2   : > { %v4422_v15 = vadd.f32 %v4421_v13, %v4343_v12  ;;  %v8478_v16 = vpop.f32.mrb[13].mxu0  ;;  %v8503_v18 = vpop.f32.mrb[19].mxu1 }
 0x6a4   : > { %v4498_v17 = vadd.f32 %v4497_v2, %v4422_v15 }
 0x6a5   : > { %v4571_v19 = vpop.f32.mrb[14].mxu0 }
 0x6a6   : > { %v4572_v20 = vadd.f32 %v4571_v19, %v4498_v17  ;;  %v8488_v21 = vpop.f32.mrb[15].mxu0 }
 0x6a8   : > { %v4646_v22 = vadd.f32 %v4645_v8, %v4572_v20 }
 0x6a9   : > { %v4719_v23 = vpop.f32.mrb[16].mxu0 }
 0x6aa   : > { %v4720_v25 = vadd.f32 %v4719_v23, %v4646_v22  ;;  %v8498_v26 = vpop.f32.mrb[17].mxu0 }
 0x6ac   : > { %v10181_v27 = vadd.f32 %v4791_v14, %v4720_v25 }
 0x6d8   : > { %v5245_v28 = vpop.f32.mrb[18].mxu0 }
 0x6d9   : > { %v8533_v29 = vpop.f32.mrb[19].mxu0  ;;  %v5249_v30 = vsel %vm2060_vm2, %v5245_v28, -inf }
 0x6da   : > { %5250 = vmax.xlane.f32.xlu1 %v5249_v30 }
 0x767   : > { %v5251_v31 = vpop.xlane.xlu1 %5250 }
 0x768   : > { %v5252_v32 = vsub.f32 %v5245_v28, %v5251_v31 }
 0x76a   : > { %v5253_v33 = vmul.f32 1.442695, %v5252_v32 }
 0x76c   : > { %9028 = vpow2.f32 %v5253_v33 }
 0x776   : > { %v9029_v34 = vpop.eup %9028 }
 0x777   : > { %v5255_v35 = vsel %vm2060_vm2, %v9029_v34, 0.0 }
 0x778   : > { %5256 = vadd.xlane.f32.xlu0 %v5255_v35 }
 0x78e   : > { %5262 = vrot.lane.b32.xlu0 %v10040_v24, %s9396_s13 }
 0x792   : > { %6166 = vrot.lane.b32.xlu0 %v9993_v57, %s9397_s3 }
 0x796   : > { %6168 = vrot.lane.b32.xlu0 %v9997_v59, %s9397_s3 }
 0x805   : > { %v5257_v36 = vpop.xlane.xlu0 %5256 }
 0x806   : > { %9030 = vrcp.f32 %v5257_v36 }
 0x809   : > { %v5263_v37 = vpop.permute.xlu0 %5262 }
 0x80a   : > { %v5269_v38 = vand.u32 4294901760, %v5263_v37 }
 0x80c   : > { %8535 = vmatpush3.msra.mxu1 %v5269_v38  ;;  %v5346_v41 = vsub.f32 %v5263_v37, %v5269_v38 }
 0x80d   : > { %8539 = vmatprep.subr.mxu1 %v9394_v1  ;;  %v6167_v55 = vpop.permute.xlu0 %6166 }
 0x80e   : > { %v5347_v44 = vand.u32 4294901760, %v5346_v41  ;;  %v6170_v63 = vsel %vm2060_vm2, %v6167_v55, 0  ;;  %v2059_v55 = vld [vmem:[#allocation13 + $0x18] sm:$0xff] }
 0x80f   : > { %v6240_v5 = vand.u32 4294901760, %v6170_v63 }
 0x810   : > { %v9031_v39 = vpop.eup %9030  ;;  %v5348_v46 = vsub.f32 %v5346_v41, %v5347_v44 }
 0x811   : > { %v5259_v40 = vmul.f32 %v9031_v39, %v9029_v34  ;;  %v6169_v61 = vpop.permute.xlu0 %6168  ;;  %v6241_v8 = vsub.f32 %v6170_v63, %v6240_v5 }
 0x812   : > { %v5349_v48 = vand.u32 4294901760, %v5348_v46  ;;  %v6172_v3 = vsel %vm2060_vm2, %v6169_v61, 0 }
 0x813   : > { %7877 = vst.msk [vmem:[%s10066_s18 + $0x10] sm:$0xff] %vm2060_vm2, %v5259_v40  ;;  %v5266_v42 = vsel %vm2060_vm2, %v5259_v40, 0  ;;  %v6175_v6 = vand.u32 4294901760, %v6172_v3  ;;  %v6242_v10 = vand.u32 4294901760, %v6241_v8 }
 0x814   : > { %v5334_v43 = vand.u32 4294901760, %v5266_v42 }
 0x815   : > { %v6252_v9 = vsub.f32 %v6172_v3, %v6175_v6  ;;  %v6243_v12 = vsub.f32 %v6241_v8, %v6242_v10 }
 0x816   : > { %v5335_v57 = vsub.f32 %v5266_v42, %v5334_v43 }
 0x817   : > { %v6253_v11 = vand.u32 4294901760, %v6252_v9  ;;  %v6244_v14 = vand.u32 4294901760, %v6243_v12 }
 0x818   : > { %v5336_v45 = vand.u32 4294901760, %v5335_v57 }
 0x819   : > { %v6254_v13 = vsub.f32 %v6252_v9, %v6253_v11 }
 0x81a   : > { %v5337_v59 = vsub.f32 %v5335_v57, %v5336_v45 }
 0x81b   : > { %v6255_v15 = vand.u32 4294901760, %v6254_v13 }
 0x81c   : > { %v5338_v47 = vand.u32 4294901760, %v5337_v59 }
 0x81e   : > { %8537 = vmatmul.mubr.f32.vlgmr.msra.gmra.mrb[20].mxu1 %v5338_v47 }
 0x81f   : > { %8540 = vmatpush3.msra.mxu1 %v5349_v48  ;;  %8541 = vmatprep.mubr.msk.f32.mxu1 %vm9393_vm0, %v9394_v1 }
 0x820   : > { %8544 = vmatprep.subr.mxu1 %v9394_v1 }
 0x826   : > { %8542 = vmatmul.mubr.f32.vlgmr.msra.gmra.mrb[20].mxu1 %v5334_v43 }
 0x827   : > { %8545 = vmatpush3.msra.mxu1 %v5346_v41  ;;  %8546 = vmatprep.mubr.msk.f32.mxu1 %vm9393_vm0, %v9394_v1 }
 0x828   : > { %8549 = vmatprep.subr.mxu1 %v9394_v1 }
 0x82e   : > { %8547 = vmatmul.mubr.f32.vlgmr.msra.gmra.mrb[20].mxu1 %v5335_v57 }
 0x82f   : > { %8550 = vmatpush3.msra.mxu1 %v5269_v38  ;;  %8551 = vmatprep.mubr.msk.f32.mxu1 %vm9393_vm0, %v9394_v1 }
 0x830   : > { %8554 = vmatprep.subr.mxu1 %v9394_v1 }
 0x836   : > { %8552 = vmatmul.mubr.f32.vlgmr.msra.gmra.mrb[20].mxu1 %v5336_v45 }
 0x837   : > { %8555 = vmatpush3.msra.mxu1 %v5347_v44  ;;  %8556 = vmatprep.mubr.msk.f32.mxu1 %vm9393_vm0, %v9394_v1 }
 0x838   : > { %8559 = vmatprep.subr.mxu1 %v9394_v1 }
 0x83e   : > { %8557 = vmatmul.mubr.f32.vlgmr.msra.gmra.mrb[20].mxu1 %v5334_v43 }
 0x83f   : > { %8560 = vmatpush3.msra.mxu1 %v5269_v38  ;;  %8561 = vmatprep.mubr.msk.f32.mxu1 %vm9393_vm0, %v9394_v1 }
 0x840   : > { %8569 = vmatprep.subr.mxu1 %v9394_v1 }
 0x846   : > { %8562 = vmatmul.mubr.f32.vlgmr.msra.gmra.mrb[20].mxu1 %v5334_v43 }
 0x847   : > { %8571 = vmatprep.mubr.msk.f32.mxu1 %vm9393_vm0, %v9394_v1  ;;  %8570 = vmatpush3.msra.mxu1 %v5800_v54 }
 0x848   : > { %8579 = vmatprep.subr.mxu1 %v9394_v1 }
 0x919   : > { %v5710_v56 = vpop.f32.mrb[20].mxu1 }
 0x91a   : > { %7878 = vst.msk [vmem:[%s10114_s1 + $0x10] sm:$0xff] %vm2060_vm2, %v5710_v56  ;;  %v5717_v58 = vsel %vm2060_vm2, %v5710_v56, 0  ;;  %v8563_v0 = vpop.f32.mrb[21].mxu1  ;;  %v7091_v56 = vand.u32 4294901760, %v2059_v55 }
 0x91b   : > { %v5785_v60 = vand.u32 4294901760, %v5717_v58 }
 0x91d   : > { %v5786_v62 = vsub.f32 %v5717_v58, %v5785_v60  ;;  %8572 = vmatmul.mubr.f32.vlgmr.msra.gmra.mrb[22].mxu1 %v5785_v60  ;;  %v7168_v58 = vsub.f32 %v2059_v55, %v7091_v56 }
 0x91e   : > { %8580 = vmatpush3.msra.mxu1 %v5720_v50  ;;  %8581 = vmatprep.mubr.msk.f32.mxu1 %vm9393_vm0, %v9394_v1 }
 0x91f   : > { %v5787_v2 = vand.u32 4294901760, %v5786_v62  ;;  %8589 = vmatprep.subr.mxu1 %v9394_v1  ;;  %v7169_v0 = vand.u32 4294901760, %v7168_v58 }
 0x921   : > { %v5788_v4 = vsub.f32 %v5786_v62, %v5787_v2  ;;  %8582 = vmatmul.mubr.f32.vlgmr.msra.gmra.mrb[24].mxu1 %v5787_v2 }
 0x922   : > { %8590 = vmatpush3.msra.mxu1 %v5720_v50  ;;  %8591 = vmatprep.mubr.msk.f32.mxu1 %vm9393_vm0, %v9394_v1 }
 0x923   : > { %v5789_v7 = vand.u32 4294901760, %v5788_v4  ;;  %8624 = vmatprep.subr.mxu1 %v9394_v1 }
 0x925   : > { %8567 = vmatmul.mubr.f32.vlgmr.msra.gmra.mrb[20].mxu0 %v5789_v7  ;;  %8592 = vmatmul.mubr.f32.vlgmr.msra.gmra.mrb[26].mxu1 %v5785_v60 }
 0x926   : > { %8575 = vmatpush3.msra.mxu0 %v5797_v51  ;;  %8576 = vmatprep.mubr.msk.f32.mxu0 %vm9393_vm0, %v9394_v1 }
 0x927   : > { %8584 = vmatprep.subr.mxu0 %v9394_v1  ;;  %8626 = vmatprep.mubr.msk.f32.mxu1 %vm9393_vm0, %v9394_v1 }
 0x929   : > { %8577 = vmatmul.mubr.f32.vlgmr.msra.gmra.mrb[22].mxu0 %v5786_v62 }
 0x92a   : > { %8585 = vmatpush3.msra.mxu0 %v5798_v52  ;;  %8586 = vmatprep.mubr.msk.f32.mxu0 %vm9393_vm0, %v9394_v1 }
 0x92b   : > { %8594 = vmatprep.subr.mxu0 %v9394_v1 }
 0x92d   : > { %8587 = vmatmul.mubr.f32.vlgmr.msra.gmra.mrb[24].mxu0 %v5785_v60  ;;  %v7170_v60 = vsub.f32 %v7168_v58, %v7169_v0 }
 0x92e   : > { %8596 = vmatprep.mubr.msk.f32.mxu0 %vm9393_vm0, %v9394_v1 }
 0x92f   : > { %v7171_v61 = vand.u32 4294901760, %v7170_v60 }
 0x931   : > { %8595 = vmatpush3.xpose.msra.mxu0 %v6175_v6 }
 0x932   : > { %8599 = vmatprep.subr.mxu0 %v9394_v1 }
 0x934   : > { %8597 = vmatmul.mubr.f32.vlgmr.msra.gmra.mrb[26].mxu0 %v6244_v14 }
 0x935   : > { %8600 = vmatpush3.xpose.msra.mxu0 %v6255_v15  ;;  %8601 = vmatprep.mubr.msk.f32.mxu0 %vm9393_vm0, %v9394_v1 }
 0x936   : > { %8604 = vmatprep.subr.mxu0 %v9394_v1 }
 0x93c   : > { %8602 = vmatmul.mubr.f32.vlgmr.msra.gmra.mrb[26].mxu0 %v6240_v5 }
 0x93d   : > { %8605 = vmatpush3.xpose.msra.mxu0 %v6252_v9  ;;  %8606 = vmatprep.mubr.msk.f32.mxu0 %vm9393_vm0, %v9394_v1 }
 0x93e   : > { %8609 = vmatprep.subr.mxu0 %v9394_v1 }
 0x944   : > { %8607 = vmatmul.mubr.f32.vlgmr.msra.gmra.mrb[26].mxu0 %v6241_v8 }
 0x945   : > { %8610 = vmatpush3.xpose.msra.mxu0 %v6175_v6  ;;  %8611 = vmatprep.mubr.msk.f32.mxu0 %vm9393_vm0, %v9394_v1 }
 0x946   : > { %8614 = vmatprep.subr.mxu0 %v9394_v1 }
 0x94c   : > { %8612 = vmatmul.mubr.f32.vlgmr.msra.gmra.mrb[26].mxu0 %v6242_v10 }
 0x94d   : > { %8615 = vmatpush3.xpose.msra.mxu0 %v6253_v11  ;;  %8616 = vmatprep.mubr.msk.f32.mxu0 %vm9393_vm0, %v9394_v1 }
 0x94e   : > { %8619 = vmatprep.subr.mxu0 %v9394_v1 }
 0x954   : > { %8617 = vmatmul.mubr.f32.vlgmr.msra.gmra.mrb[26].mxu0 %v6240_v5 }
 0x955   : > { %8620 = vmatpush3.xpose.msra.mxu0 %v6175_v6  ;;  %8621 = vmatprep.mubr.msk.f32.mxu0 %vm9393_vm0, %v9394_v1 }
 0x956   : > { %8654 = vmatprep.subr.mxu0 %v9394_v1 }
 0x95c   : > { %8622 = vmatmul.mubr.f32.vlgmr.msra.gmra.mrb[26].mxu0 %v6240_v5 }
 0x95d   : > { %8656 = vmatprep.mubr.msk.f32.mxu0 %vm9393_vm0, %v9394_v1  ;;  %8655 = vmatpush3.msra.mxu0 %v7091_v56 }
 0x95e   : > { %8664 = vmatprep.subr.mxu0 %v9394_v1 }
 0x9f0   : > { %v5867_v16 = vpop.f32.mrb[22].mxu1 }
 0x9f1   : > { %v8573_v18 = vpop.f32.mrb[23].mxu1 }
 0x9f4   : > { %v6015_v17 = vpop.f32.mrb[24].mxu1 }
 0x9f5   : > { %v8583_v19 = vpop.f32.mrb[25].mxu1 }
 0x9f8   : > { %v5791_v20 = vpop.f32.mrb[20].mxu0  ;;  %v6161_v21 = vpop.f32.mrb[26].mxu1 }
 0x9f9   : > { %v5868_v22 = vadd.f32 %v5867_v16, %v5791_v20  ;;  %v8568_v23 = vpop.f32.mrb[21].mxu0  ;;  %v8593_v25 = vpop.f32.mrb[27].mxu1 }
 0x9fc   : > { %v5941_v26 = vpop.f32.mrb[22].mxu0 }
 0x9fd   : > { %v5942_v28 = vadd.f32 %v5941_v26, %v5868_v22  ;;  %v8578_v29 = vpop.f32.mrb[23].mxu0  ;;  %v7881_v26 = vld [vmem:[%s10449_s7] ss:$0 sm:$0xff] }
 0x9ff   : > { %v6016_v30 = vadd.f32 %v6015_v17, %v5942_v28  ;;  %v9040_v28 = vld [vmem:[%s481_s19] sm:$0xff]  ;;  %s10325_s19 = scalar_lea.sflag [#allocation16], %s486_s28 }
 0xa00   : > { %v6089_v31 = vpop.f32.mrb[24].mxu0 }
 0xa01   : > { %v6090_v32 = vadd.f32 %v6089_v31, %v6016_v30  ;;  %v8588_v33 = vpop.f32.mrb[25].mxu0 }
 0xa03   : > { %v6162_v34 = vadd.f32 %v6161_v21, %v6090_v32 }
 0xa05   : > { %v10254_v35 = vadd.f32 %v6162_v34, %v10181_v27 }
 0xa2f   : > { %v6616_v36 = vpop.f32.mrb[26].mxu0 }
 0xa30   : > { %v8623_v37 = vpop.f32.mrb[27].mxu0  ;;  %v6620_v38 = vsel %vm2060_vm2, %v6616_v36, -inf }
 0xa31   : > { %6621 = vmax.xlane.f32.xlu0 %v6620_v38 }
 0xabe   : > { %v6622_v39 = vpop.xlane.xlu0 %6621 }
 0xabf   : > { %v6623_v40 = vsub.f32 %v6616_v36, %v6622_v39 }
 0xac1   : > { %v6624_v41 = vmul.f32 1.442695, %v6623_v40 }
 0xac3   : > { %9032 = vpow2.f32 %v6624_v41 }
 0xacd   : > { %v9033_v42 = vpop.eup %9032 }
 0xace   : > { %v6626_v43 = vsel %vm2060_vm2, %v9033_v42, 0.0 }
 0xacf   : > { %6627 = vadd.xlane.f32.xlu1 %v6626_v43 }
 0xae0   : > { %6633 = vrot.lane.b32.xlu1 %v10040_v24, %s9397_s3 }
 0xb5c   : > { %v6628_v44 = vpop.xlane.xlu1 %6627 }
 0xb5d   : > { %9034 = vrcp.f32 %v6628_v44 }
 0xb60   : > { %v6634_v27 = vpop.permute.xlu1 %6633 }
 0xb61   : > { %v6640_v57 = vand.u32 4294901760, %v6634_v27 }
 0xb63   : > { %8625 = vmatpush3.msra.mxu1 %v6640_v57  ;;  %v6717_v59 = vsub.f32 %v6634_v27, %v6640_v57 }
 0xb64   : > { %8629 = vmatprep.subr.mxu1 %v9394_v1 }
 0xb65   : > { %v6718_v49 = vand.u32 4294901760, %v6717_v59 }
 0xb67   : > { %v9035_v45 = vpop.eup %9034  ;;  %v6719_v52 = vsub.f32 %v6717_v59, %v6718_v49 }
 0xb68   : > { %v6630_v46 = vmul.f32 %v9035_v45, %v9033_v42 }
 0xb69   : > { %v6720_v54 = vand.u32 4294901760, %v6719_v52 }
 0xb6a   : > { %7879 = vst.msk [vmem:[%s10066_s18 + $0x18] sm:$0xff] %vm2060_vm2, %v6630_v46  ;;  %v6637_v47 = vsel %vm2060_vm2, %v6630_v46, 0 }
 0xb6b   : > { %v6705_v48 = vand.u32 4294901760, %v6637_v47 }
 0xb6d   : > { %v6706_v50 = vsub.f32 %v6637_v47, %v6705_v48 }
 0xb6f   : > { %v6707_v51 = vand.u32 4294901760, %v6706_v50 }
 0xb71   : > { %v6708_v24 = vsub.f32 %v6706_v50, %v6707_v51 }
 0xb73   : > { %v6709_v53 = vand.u32 4294901760, %v6708_v24 }
 0xb75   : > { %8627 = vmatmul.mubr.f32.vlgmr.msra.gmra.mrb[28].mxu1 %v6709_v53 }
 0xb76   : > { %8630 = vmatpush3.msra.mxu1 %v6720_v54  ;;  %8631 = vmatprep.mubr.msk.f32.mxu1 %vm9393_vm0, %v9394_v1 }
 0xb77   : > { %8634 = vmatprep.subr.mxu1 %v9394_v1 }
 0xb7d   : > { %8632 = vmatmul.mubr.f32.vlgmr.msra.gmra.mrb[28].mxu1 %v6705_v48 }
 0xb7e   : > { %8635 = vmatpush3.msra.mxu1 %v6717_v59  ;;  %8636 = vmatprep.mubr.msk.f32.mxu1 %vm9393_vm0, %v9394_v1 }
 0xb7f   : > { %8639 = vmatprep.subr.mxu1 %v9394_v1 }
 0xb85   : > { %8637 = vmatmul.mubr.f32.vlgmr.msra.gmra.mrb[28].mxu1 %v6706_v50 }
 0xb86   : > { %8640 = vmatpush3.msra.mxu1 %v6640_v57  ;;  %8641 = vmatprep.mubr.msk.f32.mxu1 %vm9393_vm0, %v9394_v1 }
 0xb87   : > { %8644 = vmatprep.subr.mxu1 %v9394_v1 }
 0xb8d   : > { %8642 = vmatmul.mubr.f32.vlgmr.msra.gmra.mrb[28].mxu1 %v6707_v51 }
 0xb8e   : > { %8645 = vmatpush3.msra.mxu1 %v6718_v49  ;;  %8646 = vmatprep.mubr.msk.f32.mxu1 %vm9393_vm0, %v9394_v1 }
 0xb8f   : > { %8649 = vmatprep.subr.mxu1 %v9394_v1 }
 0xb95   : > { %8647 = vmatmul.mubr.f32.vlgmr.msra.gmra.mrb[28].mxu1 %v6705_v48 }
 0xb96   : > { %8650 = vmatpush3.msra.mxu1 %v6640_v57  ;;  %8651 = vmatprep.mubr.msk.f32.mxu1 %vm9393_vm0, %v9394_v1 }
 0xb97   : > { %8659 = vmatprep.subr.mxu1 %v9394_v1 }
 0xb9d   : > { %8652 = vmatmul.mubr.f32.vlgmr.msra.gmra.mrb[28].mxu1 %v6705_v48 }
 0xb9e   : > { %8661 = vmatprep.mubr.msk.f32.mxu1 %vm9393_vm0, %v9394_v1  ;;  %8660 = vmatpush3.msra.mxu1 %v7171_v61 }
 0xb9f   : > { %8669 = vmatprep.subr.mxu1 %v9394_v1 }
 0xc70   : > { %v7081_v62 = vpop.f32.mrb[28].mxu1 }
 0xc71   : > { %7880 = vst.msk [vmem:[%s10114_s1 + $0x18] sm:$0xff] %vm2060_vm2, %v7081_v62  ;;  %v7088_v63 = vsel %vm2060_vm2, %v7081_v62, 0  ;;  %v8653_v2 = vpop.f32.mrb[29].mxu1 }
 0xc72   : > { %v7156_v3 = vand.u32 4294901760, %v7088_v63 }
 0xc74   : > { %v7157_v4 = vsub.f32 %v7088_v63, %v7156_v3  ;;  %8662 = vmatmul.mubr.f32.vlgmr.msra.gmra.mrb[30].mxu1 %v7156_v3 }
 0xc75   : > { %8670 = vmatpush3.msra.mxu1 %v7091_v56  ;;  %8671 = vmatprep.mubr.msk.f32.mxu1 %vm9393_vm0, %v9394_v1 }
 0xc76   : > { %v7158_v5 = vand.u32 4294901760, %v7157_v4  ;;  %8679 = vmatprep.subr.mxu1 %v9394_v1 }
 0xc78   : > { %v7159_v6 = vsub.f32 %v7157_v4, %v7158_v5  ;;  %8672 = vmatmul.mubr.f32.vlgmr.msra.gmra.mrb[32].mxu1 %v7158_v5 }
 0xc79   : > { %8680 = vmatpush3.msra.mxu1 %v7091_v56  ;;  %8681 = vmatprep.mubr.msk.f32.mxu1 %vm9393_vm0, %v9394_v1 }
 0xc7a   : > { %v7160_v7 = vand.u32 4294901760, %v7159_v6 }
 0xc7c   : > { %8657 = vmatmul.mubr.f32.vlgmr.msra.gmra.mrb[28].mxu0 %v7160_v7  ;;  %8682 = vmatmul.mubr.f32.vlgmr.msra.gmra.mrb[34].mxu1 %v7156_v3 }
 0xc7d   : > { %8665 = vmatpush3.msra.mxu0 %v7168_v58  ;;  %8666 = vmatprep.mubr.msk.f32.mxu0 %vm9393_vm0, %v9394_v1 }
 0xc7e   : > { %8674 = vmatprep.subr.mxu0 %v9394_v1 }
 0xc80   : > { %8667 = vmatmul.mubr.f32.vlgmr.msra.gmra.mrb[30].mxu0 %v7157_v4 }
 0xc81   : > { %8675 = vmatpush3.msra.mxu0 %v7169_v0  ;;  %8676 = vmatprep.mubr.msk.f32.mxu0 %vm9393_vm0, %v9394_v1 }
 0xc84   : > { %8677 = vmatmul.mubr.f32.vlgmr.msra.gmra.mrb[32].mxu0 %v7156_v3 }
 0xd47   : > { %v7238_v8 = vpop.f32.mrb[30].mxu1 }
 0xd48   : > { %v8663_v9 = vpop.f32.mrb[31].mxu1 }
 0xd4b   : > { %v7386_v10 = vpop.f32.mrb[32].mxu1 }
 0xd4c   : > { %v8673_v11 = vpop.f32.mrb[33].mxu1 }
 0xd4f   : > { %v7162_v12 = vpop.f32.mrb[28].mxu0  ;;  %v7532_v13 = vpop.f32.mrb[34].mxu1 }
 0xd50   : > { %v7239_v14 = vadd.f32 %v7238_v8, %v7162_v12  ;;  %v8658_v15 = vpop.f32.mrb[29].mxu0  ;;  %v8683_v16 = vpop.f32.mrb[35].mxu1 }
 0xd53   : > { %v7312_v18 = vpop.f32.mrb[30].mxu0 }
 0xd54   : > { %v7313_v17 = vadd.f32 %v7312_v18, %v7239_v14  ;;  %v8668_v19 = vpop.f32.mrb[31].mxu0 }
 0xd56   : > { %v7387_v20 = vadd.f32 %v7386_v10, %v7313_v17 }
 0xd57   : > { %v7460_v21 = vpop.f32.mrb[32].mxu0 }
 0xd58   : > { %v7461_v22 = vadd.f32 %v7460_v21, %v7387_v20  ;;  %v8678_v23 = vpop.f32.mrb[33].mxu0 }
 0xd5a   : > { %v7533_v1 = vadd.f32 %v7532_v13, %v7461_v22 }
 0xd5c   : > { %v7536_v25 = vadd.f32 %v7533_v1, %v10254_v35 }
 0xd5e   : > { %v7537_v29 = vadd.f32 %v9040_v28, %v7536_v25 }
 0xd60   : > { %v7545_v30 = vadd.f32 %v7881_v26, %v7537_v29 }
 0xd62   : > { %v7546_v31 = vsel %vm583_vm1, %v7545_v30, 0.0 }
 0xd63   : > { %7547 = vadd.xlane.f32.xlu1 %v7546_v31 }
 0xdf0   : > { %v7548_v32 = vpop.xlane.xlu1 %7547 }
 0xdf1   : > { %v7550_v33 = vmul.f32 0.03125, %v7548_v32 }
 0xdf3   : > { %v10303_v34 = vsub.f32 %v7545_v30, %v7550_v33 }
 0xdf5   : > { %v7552_v35 = vmul.f32 %v10303_v34, %v10303_v34 }
 0xdf7   : > { %v7553_v36 = vsel %vm583_vm1, %v7552_v35, 0.0 }
 0xdf8   : > { %7554 = vadd.xlane.f32.xlu0 %v7553_v36 }
 0xdf9   : > { %9256 = shalt.err (!%p9253_p4)
}
 0xdfa   : > { %s9257_s27 = scalar_lea.hbm %s10321_s12, 512  ;;  %s9261_s26 = scalar_lea.hbm %s10524_s20, 1024 }
 0xdfb   : > { %p9258_p10 = scmp.ne.s32.totalorder %s10321_s12, %s9257_s27  ;;  %p9262_p12 = scmp.lt.u32.totalorder %s10321_s12, %s10524_s20 }
 0xdfc   : > { %p9263_p0 = scmp.lt.u32.totalorder %s9261_s26, %s9257_s27  ;;  %p9265_p9 = scmp.lt.u32.totalorder %s9257_s27, %s10321_s12 }
 0xdfd   : > { %p9259_p3 = pnand %p9258_p10, %p10525_p13 }
 0xdfe   : > { %p9264_p7 = por %p9263_p0, %p9262_p12 }
 0xdff   : > { %p9260_p8 = pneg %p9259_p3 }
 0xe00   : > { %p9266_p11 = por %p9265_p9, %p9264_p7 }
 0xe02   : > { %p9267_p1 = pnand %p9266_p11, %p9260_p8 }
 0xe04   : > { %9270 = shalt.err (!%p9267_p1)
}
 0xe05   : > { %s9399_s3 = smov 128   ;;  %s9400_s5 = smov 256  }
 0xe06   : > { %s9401_s30 = smov 8   ;;  %s10526_s16 = sld [smem:[#allocation37_spill]] }
 0xe07   : > { %8925 = dma.vmem_to_hbm [thread:$0]  (%p10525_p13), %s10310_s24, 512, %s10321_s12, %s10325_s19, %s9399_s3, %s9400_s5, %s9401_s30  }
 0xe08   : > { %s9271_s29 = scalar_lea.vmem %s10312_s10, 512  ;;  %s9402_s25 = smov [#allocation17]  }
 0xe09   : > { %p9272_p6 = scmp.ne.s32.totalorder %s10312_s10, %s9271_s29  ;;  %s9275_s27 = sshll.u32 %s9402_s25, 4  ;;  %s9276_s27 = int_to_ptr.vmem [resolvable:$false] %s9275_s27 }
 0xe0a   : > { %s9277_s28 = scalar_lea.vmem %s9276_s27, 1024  ;;  %p9278_p4 = scmp.lt.s32.totalorder %s10312_s10, %s9276_s27 }
 0xe0b   : > { %p9273_p5 = pnand %p9272_p6, %p10525_p13  ;;  %p9279_p10 = scmp.lt.s32.totalorder %s9277_s28, %s9271_s29 }
 0xe0c   : > { %s10356_s17 = scalar_lea.hbm %s10526_s16, %s10315_s8 }
 0xe0d   : > { %p9274_p2 = pneg %p9273_p5  ;;  %p9280_p3 = por %p9279_p10, %p9278_p4 }
 0xe0f   : > { %p9281_p8 = pnand %p9280_p3, %p9274_p2 }
 0xe11   : > { %9284 = shalt.err (!%p9281_p8)
}
 0xe12   : > { %s9285_s24 = scalar_lea.hbm %s10356_s17, 512  ;;  %s9289_s26 = scalar_lea.hbm %s10526_s16, 1024 }
 0xe13   : > { %p9286_p12 = scmp.ne.s32.totalorder %s10356_s17, %s9285_s24  ;;  %p9290_p9 = scmp.lt.u32.totalorder %s10356_s17, %s10526_s16 }
 0xe14   : > { %p9291_p11 = scmp.lt.u32.totalorder %s9289_s26, %s9285_s24  ;;  %p9293_p6 = scmp.lt.u32.totalorder %s9285_s24, %s10356_s17 }
 0xe15   : > { %p9287_p0 = pnand %p9286_p12, %p10525_p13 }
 0xe16   : > { %p9292_p1 = por %p9291_p11, %p9290_p9 }
 0xe17   : > { %p9288_p7 = pneg %p9287_p0 }
 0xe18   : > { %p9294_p5 = por %p9293_p6, %p9292_p1 }
 0xe1a   : > { %p9295_p2 = pnand %p9294_p5, %p9288_p7 }
 0xe1c   : > { %9298 = shalt.err (!%p9295_p2)
}
 0xe1d   : > { %8926 = dma.vmem_to_hbm [thread:$0]  (%p10525_p13), %s10312_s10, 512, %s10356_s17, %s10325_s19, %s9399_s3, %s9400_s5, %s9401_s30  }
 0xe1e   : > { %s10527_s10 = sld [smem:[#allocation33_spill]]  ;;  %s10528_s5 = sld [smem:[#allocation34_spill]] }
 0xe1f   : > { %s561_s30 = scalar_lea.vmem [#allocation14], %s9757_s11  ;;  %s10529_s27 = sld [smem:[#allocation35_spill]] }
 0xe20   : > { %s7609_s17 = sshll.u32 %s561_s30, 4  ;;  %s7586_s24 = scalar_lea.sflag [#allocation4], %s9754_s14  ;;  %s10397_s17 = int_to_ptr.vmem [resolvable:$true] %s7609_s17 }
 0xe21   : > { %s9299_s12 = scalar_lea.vmem %s10397_s17, 128  ;;  %s9403_s11 = smov [#allocation14]  }
 0xe22   : > { %p9300_p4 = scmp.ne.s32.totalorder %s10397_s17, %s9299_s12  ;;  %s9303_s13 = sshll.u32 %s9403_s11, 4  ;;  %s9304_s13 = int_to_ptr.vmem [resolvable:$false] %s9303_s13 }
 0xe23   : > { %s9305_s26 = scalar_lea.vmem %s9304_s13, 256  ;;  %p9306_p8 = scmp.lt.s32.totalorder %s10397_s17, %s9304_s13 }
 0xe24   : > { %v7882_v57 = vld [vmem:[%s10527_s10] ss:$0 sm:$0xff]  ;;  %p9301_p10 = pnand %p9300_p4, %p10525_p13  ;;  %p9307_p12 = scmp.lt.s32.totalorder %s9305_s26, %s9299_s12 }
 0xe25   : > { %v7883_v46 = vld [vmem:[%s10528_s5] ss:$0 sm:$0xff]  ;;  %s10395_s28 = scalar_lea.hbm %s10529_s27, %s10315_s8 }
 0xe26   : > { %p9302_p3 = pneg %p9301_p10  ;;  %p9308_p0 = por %p9307_p12, %p9306_p8 }
 0xe28   : > { %p9309_p7 = pnand %p9308_p0, %p9302_p3 }
 0xe85   : > { %v7555_v37 = vpop.xlane.xlu0 %7554 }
 0xe86   : > { %v7557_v38 = vmul.f32 0.032258064, %v7555_v37 }
 0xe88   : > { %9036 = vrsqrt.f32 %v7557_v38  ;;  %vm7560_vm3 = vcmp.eq.f32.partialorder %v7557_v38, inf  ;;  %v7563_v41 = vand.u32 2147483648, %v7557_v38  ;;  %vm7562_vm4 = vcmp.eq.f32.partialorder %v7557_v38, 0.0 }
 0xe92   : > { %v9037_v39 = vpop.eup %9036 }
 0xe93   : > { %v7559_v40 = vmul.f32 %v9037_v39, %v7557_v38 }
 0xe95   : > { %v7561_v42 = vsel %vm7560_vm3, %v7557_v38, %v7559_v40 }
 0xe96   : > { %v7564_v43 = vsel %vm7562_vm4, %v7563_v41, %v7561_v42 }
 0xe97   : > { %v7565_v44 = vadd.f32 0.001, %v7564_v43 }
 0xe99   : > { %9038 = vrcp.f32 %v7565_v44 }
 0xea3   : > { %v9039_v27 = vpop.eup %9038 }
 0xea4   : > { %v7567_v45 = vmul.f32 %v9039_v27, %v10303_v34 }
 0xea6   : > { %v7575_v59 = vmul.f32 %v7882_v57, %v7567_v45 }
 0xea8   : > { %v7583_v47 = vadd.f32 %v7883_v46, %v7575_v59 }
 0xeaa   : > { %7584 = vst.msk [vmem:[%s561_s30] sm:$0xff] %vm583_vm1, %v7583_v47 }
 0xeab   : > { %9312 = shalt.err (!%p9309_p7)
}
 0xeac   : > { %s9313_s14 = scalar_lea.hbm %s10395_s28, 128  ;;  %s9317_s1 = scalar_lea.hbm %s10529_s27, 256 }
 0xead   : > { %p9314_p9 = scmp.ne.s32.totalorder %s10395_s28, %s9313_s14  ;;  %p9318_p6 = scmp.lt.u32.totalorder %s10395_s28, %s10529_s27 }
 0xeae   : > { %p9319_p5 = scmp.lt.u32.totalorder %s9317_s1, %s9313_s14  ;;  %p9321_p4 = scmp.lt.u32.totalorder %s9313_s14, %s10395_s28 }
 0xeaf   : > { %p9315_p11 = pnand %p9314_p9, %p10525_p13 }
 0xeb0   : > { %p9320_p2 = por %p9319_p5, %p9318_p6 }
 0xeb1   : > { %p9316_p1 = pneg %p9315_p11 }
 0xeb2   : > { %p9322_p10 = por %p9321_p4, %p9320_p2 }
 0xeb4   : > { %p9323_p3 = pnand %p9322_p10, %p9316_p1 }
 0xeb6   : > { %9326 = shalt.err (!%p9323_p3)
}
 0xeb7   : > { %8924 = dma.vmem_to_hbm [thread:$0]  (%p10525_p13), %s10397_s17, 128, %s10395_s28, %s7586_s24  }
 0xeb8 PF: > { %s10530_s10 = sld [smem:[#allocation24_spill]]  ;;  %s10531_s19 = sld [smem:[#allocation29_spill]] }
 0xeb9   : > { %s10532_s3 = sld [smem:[#allocation25_spill]] }
 0xebe   : > { %s7651_s5 = sand.u32 1, %s10530_s10   ;;  %p10533_p8 = scmp.ne.s32.totalorder %s10531_s19, 0 }
 0xebf   : > { %p10534_p12 = scmp.ge.s32.totalorder %s10532_s3, 2  ;;  %s7652_s30 = scalar_lea.sflag [#allocation4], %s7651_s5 }
 0xec1   : > { %p8954_p0 = pnand %p10534_p12, %p10533_p8 }
 0xec3   : > { %9360 = dma.done.wait (!%p8954_p0), %s7652_s30, 128  }
 0xec4   : > { %9362 = vsyncadd (!%p8954_p0), %s7652_s30, 4294967168  ;;  %s10535_s29 = sadd.s32 4294967294, %s10532_s3  }
 0xec5   : > { %s7660_s25 = sand.u32 1, %s10535_s29  }
 0xec6   : > { %s7661_s12 = scalar_lea.sflag [#allocation16], %s7660_s25 }
 0xec7   : > { %9364 = dma.done.wait (!%p8954_p0), %s7661_s12, 1024  }
 0xec8   : > { %9366 = vsyncadd (!%p8954_p0), %s7661_s12, 4294966272  ;;  %s10536_s24 = sld [smem:[#allocation26_spill]]  ;;  %s10537_s15 = sld [smem:[#allocation27_spill]] }
 0xec9   : > { %s10538_s21 = smov %s9373_s22  ;;  %s10539_s22 = smov %s9377_s23 }
 0xece   : > { %p34_p13 = scmp.ge.s32.totalorder %s10536_s24, 4   ;;  %s10540_s23 = smov %s10537_s15 }
 0xed0   :  { %36 = sbr.rel (!%p34_p13) target bundleno = 20 (0x14), region = 183 }
 0xed7   :  { %7675 = vsyncpa [#allocation3], 1 }
 0xed8   :  { %7677 = vsyncpa [#allocation3 + $0x1], 1 }
 0xed9   :  { %7678 = vsyncpa [#allocation6], 1 }
 0xeda   :  { %7680 = vsyncpa [#allocation6 + $0x1], 1 }
 0xedb   :  { %7681 = vsyncpa [#allocation9], 1 }
 0xedc   :  { %7682 = vsyncpa [#allocation12], 1 }
 0xedd   :  { %7683 = vsyncpa [#allocation4], 1 }
 0xede   :  { %7685 = vsyncpa [#allocation4 + $0x1], 1 }
 0xedf   :  { %7686 = vsyncpa [#allocation16], 1 }
 0xee0   :  { %7688 = vsyncpa [#allocation16 + $0x1], 1 }

</bundles_post_ra>
